<compile_context>
chip_gen: v5e
topology: v5e:2x2
jax: 0.10.0
libtpu: 0.0.40
codegen_flags: <defaults>
</compile_context>

<pallas_src>
import functools

import jax
import jax.numpy as jnp
from jax import lax
from jax.experimental import pallas as pl
from jax.experimental.pallas import tpu as pltpu

J = 3                          # number of filter taps (W_d / W_u / W_b1 / W_b2)
J_H = 5                        # harmonic filter: P squared (J_H - 1) times -> P^16
_HARM_STEPS = 2 ** (J_H - 1)   # 16 matrix-free applications of P = I - eps*Lh
_SQUARING_MAX_N1 = 1024        # below this, explicit squaring beats the 16-step chain


# ----------------------------------------------------------------------------
# small helpers: VMEM accounting + budget-driven tiling
# ----------------------------------------------------------------------------
def _rup(x, m):
    return ((x + m - 1) // m) * m


def _vbytes(rows, cols, dtype):
    """VMEM bytes of a 2-D array after (sublane, lane) tile padding."""
    it = jnp.dtype(dtype).itemsize
    sub = {4: 8, 2: 16, 1: 32}[it]
    return _rup(max(rows, 1), sub) * _rup(max(cols, 1), 128) * it


def _vmem_capacity_bytes():
    try:
        cap = int(pltpu.get_tpu_info().vmem_capacity_bytes)
        if cap > 0:
            return cap
    except Exception:
        pass
    return 64 << 20            # conservative fallback (v7x per-core VMEM)


def _k1_vmem_estimate(n1p, n0, n2, c, h, use_squaring):
    lh_dt = jnp.float32 if use_squaring else jnp.bfloat16
    est = _vbytes(n1p, n1p, lh_dt)                                   # Lh
    est += _vbytes(n1p, c, jnp.float32) + _vbytes(n0, c, jnp.float32)
    est += _vbytes(n2, c, jnp.float32)
    est += _vbytes(n1p, n0, jnp.float32) + _vbytes(n1p, n2, jnp.float32)   # B1^T, B2
    est += 5 * _vbytes(c, h, jnp.float32) + _vbytes(c, 4, jnp.float32)     # weights
    est += _vbytes(n1p, h, jnp.float32) + 2 * _vbytes(n1p, h, jnp.bfloat16)  # outs
    est += _vbytes(n1p, 4, jnp.float32)                                     # proj
    if use_squaring:
        est += 3 * _vbytes(n1p, n1p, jnp.float32)   # P / P^2 temporaries
    else:
        est += 2 * _vbytes(n1p, c, jnp.float32)     # fori carry temporaries
    return est + (4 << 20)


def _k2_vmem_estimate(tile, n1p, h, nc_pad):
    whole = (2 * _vbytes(n1p, h, jnp.bfloat16)            # zWd, zWu
             + _vbytes(2, n1p, jnp.float32)               # u rows
             + _vbytes(h, h, jnp.float32) + _vbytes(1, h, jnp.float32)
             + _vbytes(h, nc_pad, jnp.float32) + _vbytes(1, nc_pad, jnp.float32))
    per_tile = (2 * _vbytes(tile, n1p, jnp.int8)          # mask tiles
                + _vbytes(tile, h, jnp.float32)           # bias tile
                + _vbytes(tile, 2, jnp.float32)           # v tile
                + _vbytes(tile, nc_pad, jnp.float32))     # out tile
    # implicit temporaries: one f32 sigmoid slab + two bf16 masked slabs live
    temps = _vbytes(tile, n1p, jnp.float32) + 2 * _vbytes(tile, n1p, jnp.bfloat16)
    return whole + 2 * per_tile + temps + (4 << 20)


def _pick_tile(n1, h, nc_pad, budget):
    """Largest row tile that fits the VMEM budget; prefer >=4 grid steps."""
    n1_128 = _rup(n1, 128)
    cands = [t for t in (512, 256, 128, 64, 32) if t <= n1_128] or [128]
    fits = []
    for t in cands:                                   # descending tile size
        n1p = _rup(n1, max(t, 128))
        if _k2_vmem_estimate(t, n1p, h, nc_pad) <= budget:
            fits.append((t, n1p))
    if not fits:
        # TODO(synk): very large N1 may not fit VMEM even at TILE=32; a K-blocked
        # (column-tiled) attention accumulation would be needed for that regime.
        t = cands[-1]
        return t, _rup(n1, max(t, 128))
    for t, n1p in fits:
        if n1p // t >= 4 and t >= 128:                # feed both v7x TensorCores
            return t, n1p
    return fits[0]


# ----------------------------------------------------------------------------
# Kernel 1 (single invocation): harmonic filter + folded bias + pre-multiplied
# z1*W streams + fused attention projections.
# ----------------------------------------------------------------------------
def _prep_kernel(lh_ref, z1_ref, z0_ref, z2_ref, b1t_ref, b2_ref, eps_ref,
                 attn_w_ref, wd_ref, wu_ref, wb1_ref, wb2_ref, wh_ref,
                 bias_ref, zwd_ref, zwu_ref, proj_ref, *, use_squaring):
    eps = eps_ref[0]
    z1 = z1_ref[...]                                      # (N1P, C) f32

    if use_squaring:
        # small graphs: explicit P^2, P^4, P^8, P^16 -> full-width MXU pushes
        n = lh_ref.shape[0]
        rows = lax.broadcasted_iota(jnp.int32, (n, n), 0)
        cols = lax.broadcasted_iota(jnp.int32, (n, n), 1)
        eye = jnp.where(rows == cols, jnp.float32(1.0), jnp.float32(0.0))
        p = eye - eps * lh_ref[...].astype(jnp.float32)
        for _ in range(J_H - 1):
            p = jnp.dot(p, p, preferred_element_type=jnp.float32)
        y16 = jnp.dot(p, z1, preferred_element_type=jnp.float32)
    else:
        # large graphs: matrix-free y <- y - eps*(Lh @ y), Lh kept in bf16
        lh = lh_ref[...]
        def step(_, y):
            return y - eps * jnp.dot(lh, y.astype(lh.dtype),
                                     preferred_element_type=jnp.float32)
        y16 = lax.fori_loop(0, _HARM_STEPS, step, z1, unroll=True)

    # folded "bias" stream: (B1^T z0) Wb1_sum + (B2 z2) Wb2_sum + (P^16 z1) W_h
    bias = jnp.dot(
        jnp.dot(b1t_ref[...], z0_ref[...], preferred_element_type=jnp.float32),
        wb1_ref[...], preferred_element_type=jnp.float32)
    bias = bias + jnp.dot(
        jnp.dot(b2_ref[...], z2_ref[...], preferred_element_type=jnp.float32),
        wb2_ref[...], preferred_element_type=jnp.float32)
    bias = bias + jnp.dot(y16, wh_ref[...], preferred_element_type=jnp.float32)
    bias_ref[...] = bias

    # pre-multiplied aggregation operands (bf16 for the kernel-2 MXU passes)
    zwd_ref[...] = jnp.dot(z1, wd_ref[...],
                           preferred_element_type=jnp.float32).astype(zwd_ref.dtype)
    zwu_ref[...] = jnp.dot(z1, wu_ref[...],
                           preferred_element_type=jnp.float32).astype(zwu_ref.dtype)

    # fused attention projections, columns = [d_src, u_src, d_dst, u_dst]
    proj_ref[...] = jnp.dot(z1, attn_w_ref[...], preferred_element_type=jnp.float32)


# ----------------------------------------------------------------------------
# Kernel 2: attention (masked sigmoid) + aggregation + MLP head, row-tiled.
# ----------------------------------------------------------------------------
def _gsan_tile_kernel(mask_d_ref, mask_u_ref, v_ref, bias_ref,
                      u_ref, zwd_ref, zwu_ref, attn_b_ref,
                      m1w_ref, m1b_ref, m2w_ref, m2b_ref, out_ref):
    # L1_d / L1_u are symmetric (B^T B, B B^T), so the PyTorch double index_put
    # collapses to: L_attn[p, q] = sigmoid(u_src[q] + v_dst[p] + b) where mask.
    u_d = u_ref[0:1, :]                 # (1, N1P)  src-side score of every edge
    u_u = u_ref[1:2, :]
    v_d = v_ref[:, 0:1]                 # (TILE, 1) dst-side score of tile rows
    v_u = v_ref[:, 1:2]
    b_d = attn_b_ref[0]
    b_u = attn_b_ref[1]

    # d-path to completion first so only one (TILE, N1P) score slab pair is live
    a_d = jnp.where(mask_d_ref[...] != 0,
                    jax.nn.sigmoid(v_d + u_d + b_d), 0.0).astype(jnp.bfloat16)
    agg = jnp.dot(a_d, zwd_ref[...], preferred_element_type=jnp.float32)
    a_u = jnp.where(mask_u_ref[...] != 0,
                    jax.nn.sigmoid(v_u + u_u + b_u), 0.0).astype(jnp.bfloat16)
    agg = agg + jnp.dot(a_u, zwu_ref[...], preferred_element_type=jnp.float32)

    z1_out = jnp.maximum(agg + bias_ref[...], 0.0)        # relu (dropout = id, eval)

    # MLP head: Linear -> ReLU -> Dropout(identity) -> Linear (lane-padded out)
    h = jnp.maximum(
        jnp.dot(z1_out, m1w_ref[...], preferred_element_type=jnp.float32)
        + m1b_ref[...], 0.0)
    out_ref[...] = (jnp.dot(h, m2w_ref[...], preferred_element_type=jnp.float32)
                    + m2b_ref[...])


# ----------------------------------------------------------------------------
# Parameters / wrapper
# ----------------------------------------------------------------------------
def init_params(key, in_channels, hidden_channels, num_classes):
    ks = jax.random.split(key, 12)
    return {
        "W_d":  jax.random.normal(ks[0], (J, in_channels, hidden_channels), jnp.float32),
        "W_u":  jax.random.normal(ks[1], (J, in_channels, hidden_channels), jnp.float32),
        "W_h":  jax.random.normal(ks[2], (in_channels, hidden_channels), jnp.float32),
        "W_b1": jax.random.normal(ks[3], (J, in_channels, hidden_channels), jnp.float32),
        "W_b2": jax.random.normal(ks[4], (J, in_channels, hidden_channels), jnp.float32),
        # nn.Linear(in=2C, out=1) stored pre-transposed as (2C, 1), bias (1, 1)
        "attn_d_w": 0.1 * jax.random.normal(ks[5], (2 * in_channels, 1), jnp.float32),
        "attn_d_b": jnp.zeros((1, 1), jnp.float32),
        "attn_u_w": 0.1 * jax.random.normal(ks[6], (2 * in_channels, 1), jnp.float32),
        "attn_u_b": jnp.zeros((1, 1), jnp.float32),
        # MLP head, weights stored pre-transposed (in, out)
        "mlp_w1": 0.1 * jax.random.normal(ks[7], (hidden_channels, hidden_channels), jnp.float32),
        "mlp_b1": 0.01 * jax.random.normal(ks[8], (1, hidden_channels), jnp.float32),
        "mlp_w2": 0.1 * jax.random.normal(ks[9], (hidden_channels, num_classes), jnp.float32),
        "mlp_b2": 0.01 * jax.random.normal(ks[10], (1, num_classes), jnp.float32),
    }


def gsan_classifier_forward(params, z0, z1, z2, L0, L1_d, L1_u, L2, B1, B2):
    # L0 / L2 only feed z0_out / z2_out, which the classifier head discards.
    del L0, L2
    f32, bf16 = jnp.float32, jnp.bfloat16
    z0 = z0.astype(f32); z1 = z1.astype(f32); z2 = z2.astype(f32)
    L1_d = L1_d.astype(f32); L1_u = L1_u.astype(f32)

    N0, C = z0.shape
    N1 = z1.shape[0]
    N2 = z2.shape[0]
    H = params["mlp_w1"].shape[0]
    num_classes = params["mlp_w2"].shape[1]
    NC_PAD = _rup(num_classes, 128)

    # ---- plain-JAX glue ------------------------------------------------------
    # TODO(synk): torch.linalg.eigvalsh has no Pallas equivalent; lambda_max (-> eps)
    # uses jnp.linalg.eigvalsh for exact reference semantics (power iteration would
    # be cheaper for large N1 but perturbs eps).
    Lh = L1_d + L1_u
    lam_max = jnp.linalg.eigvalsh(Lh)[-1]
    eps = jnp.where(lam_max > 0, 0.5 * (2.0 / lam_max), 0.1).astype(f32).reshape(1)

    capacity = _vmem_capacity_bytes()
    budget = int(capacity * 0.8)
    TILE, N1P = _pick_tile(N1, H, NC_PAD, budget)
    pad = N1P - N1

    # pad the edge (N1) axis so every row tile is full-size and lane dims are
    # multiples of 128; padded rows/cols are zero so they contribute nothing.
    z1p = jnp.pad(z1, ((0, pad), (0, 0)))
    L1_d_p = jnp.pad(L1_d, ((0, pad), (0, pad)))
    L1_u_p = jnp.pad(L1_u, ((0, pad), (0, pad)))
    Lh_p = jnp.pad(Lh, ((0, pad), (0, pad)))
    B1Tp = jnp.pad(B1.astype(f32).T, ((0, pad), (0, 0)))          # (N1P, N0)
    B2p = jnp.pad(B2.astype(f32), ((0, pad), (0, 0)))             # (N1P, N2)

    # int8 nonzero masks -- the Laplacian values are only ever used as a mask
    mask_d = (L1_d_p != 0).astype(jnp.int8)
    mask_u = (L1_u_p != 0).astype(jnp.int8)

    # fold the per-tap weights: sum_j L @ z @ W[j] == L @ z @ sum_j W[j]
    wd = params["W_d"].sum(0).astype(f32)
    wu = params["W_u"].sum(0).astype(f32)
    wb1 = params["W_b1"].sum(0).astype(f32)
    wb2 = params["W_b2"].sum(0).astype(f32)
    wh = params["W_h"].astype(f32)

    # fused attention projections: columns = [d_src, u_src, d_dst, u_dst]
    attn_w = jnp.concatenate(
        [params["attn_d_w"][:C], params["attn_u_w"][:C],
         params["attn_d_w"][C:], params["attn_u_w"][C:]], axis=1).astype(f32)
    attn_b = jnp.concatenate([params["attn_d_b"].reshape(1),
                              params["attn_u_b"].reshape(1)]).astype(f32)

    # lane-dense output: pad num_classes to a multiple of 128 (unmasked stores)
    m1w = params["mlp_w1"].astype(f32)
    m1b = params["mlp_b1"].astype(f32)
    m2w = jnp.zeros((H, NC_PAD), f32).at[:, :num_classes].set(params["mlp_w2"])
    m2b = jnp.zeros((1, NC_PAD), f32).at[:, :num_classes].set(params["mlp_b2"])

    # ---- kernel 1: harmonic filter + bias + pre-multiplied streams -----------
    use_squaring = N1P <= _SQUARING_MAX_N1
    lh_in = Lh_p.astype(f32 if use_squaring else bf16)
    # TODO(synk): for very large N1 the full N1P x N1P Lh still lives in VMEM;
    # a row-tiled ping-pong recursion would be needed beyond that.
    k1_limit = min(max(_k1_vmem_estimate(N1P, N0, N2, C, H, use_squaring), 16 << 20),
                   capacity)

    bias, zwd, zwu, proj = pl.pallas_call(
        functools.partial(_prep_kernel, use_squaring=use_squaring),
        out_shape=(jax.ShapeDtypeStruct((N1P, H), f32),
                   jax.ShapeDtypeStruct((N1P, H), bf16),
                   jax.ShapeDtypeStruct((N1P, H), bf16),
                   jax.ShapeDtypeStruct((N1P, 4), f32)),
        in_specs=([pl.BlockSpec(memory_space=pltpu.MemorySpace.VMEM)] * 6
                  + [pl.BlockSpec(memory_space=pltpu.MemorySpace.SMEM)]
                  + [pl.BlockSpec(memory_space=pltpu.MemorySpace.VMEM)] * 6),
        out_specs=(pl.BlockSpec(memory_space=pltpu.MemorySpace.VMEM),) * 4,
        compiler_params=pltpu.CompilerParams(vmem_limit_bytes=k1_limit),
    )(lh_in, z1p, z0, z2, B1Tp, B2p, eps, attn_w, wd, wu, wb1, wb2, wh)

    u_rows = proj[:, 0:2].T        # (2, N1P): [d_src; u_src], lane-dense rows
    v_cols = proj[:, 2:4]          # (N1P, 2): [d_dst, u_dst], row-tiled

    # ---- kernel 2: attention + aggregation + MLP head, row-tiled over N1P ----
    k2_limit = min(max(_k2_vmem_estimate(TILE, N1P, H, NC_PAD), 16 << 20), capacity)

    grid_spec = pltpu.PrefetchScalarGridSpec(
        num_scalar_prefetch=0,
        grid=(N1P // TILE,),
        in_specs=[
            pl.BlockSpec((TILE, N1P), lambda i: (i, 0)),          # mask_d tile (int8)
            pl.BlockSpec((TILE, N1P), lambda i: (i, 0)),          # mask_u tile (int8)
            pl.BlockSpec((TILE, 2), lambda i: (i, 0)),            # v (dst scores) tile
            pl.BlockSpec((TILE, H), lambda i: (i, 0)),            # bias tile
            pl.BlockSpec(memory_space=pltpu.MemorySpace.VMEM),    # u rows (2, N1P)
            pl.BlockSpec(memory_space=pltpu.MemorySpace.VMEM),    # zWd (N1P, H) bf16
            pl.BlockSpec(memory_space=pltpu.MemorySpace.VMEM),    # zWu (N1P, H) bf16
            pl.BlockSpec(memory_space=pltpu.MemorySpace.SMEM),    # attn biases (2,)
            pl.BlockSpec(memory_space=pltpu.MemorySpace.VMEM),    # mlp_w1
            pl.BlockSpec(memory_space=pltpu.MemorySpace.VMEM),    # mlp_b1
            pl.BlockSpec(memory_space=pltpu.MemorySpace.VMEM),    # mlp_w2 (padded)
            pl.BlockSpec(memory_space=pltpu.MemorySpace.VMEM),    # mlp_b2 (padded)
        ],
        out_specs=pl.BlockSpec((TILE, NC_PAD), lambda i: (i, 0)),
    )

    out_pad = pl.pallas_call(
        _gsan_tile_kernel,
        out_shape=jax.ShapeDtypeStruct((N1P, NC_PAD), f32),
        grid_spec=grid_spec,
        compiler_params=pltpu.CompilerParams(
            dimension_semantics=("parallel",),        # row tiles are independent
            vmem_limit_bytes=k2_limit),
    )(mask_d, mask_u, v_cols, bias, u_rows, zwd, zwu, attn_b, m1w, m1b, m2w, m2b)

    return out_pad[:N1, :num_classes]


# ----------------------------------------------------------------------------
# Pure-JAX reference (exact PyTorch eval-mode semantics) for validation
# ----------------------------------------------------------------------------
def _reference_forward(params, z0, z1, z2, L1_d, L1_u, B1, B2):
    C = z1.shape[1]

    def attn(L, w, b):
        u = z1 @ w[:C]
        v = z1 @ w[C:]
        s = jax.nn.sigmoid(u + v.T + b)           # s[a, b] = score(src=a, dst=b)
        # exact double index_put semantics of compute_attention
        return jnp.where(L.T != 0, s.T, jnp.where(L != 0, s, 0.0))

    Ld_a = attn(L1_d, params["attn_d_w"], params["attn_d_b"])
    Lu_a = attn(L1_u, params["attn_u_w"], params["attn_u_b"])

    Lh = L1_d + L1_u
    lam = jnp.linalg.eigvalsh(Lh)[-1]
    eps = jnp.where(lam > 0, 0.5 * (2.0 / lam), 0.1)
    P = jnp.eye(L1_d.shape[0], dtype=jnp.float32) - eps * Lh
    for _ in range(J_H - 1):
        P = P @ P

    out = jnp.zeros((z1.shape[0], params["W_d"].shape[2]), jnp.float32)
    for j in range(J):
        out = out + Ld_a @ z1 @ params["W_d"][j]
        out = out + Lu_a @ z1 @ params["W_u"][j]
        out = out + B1.T @ z0 @ params["W_b1"][j]
        out = out + B2 @ z2 @ params["W_b2"][j]
    out = out + P @ z1 @ params["W_h"]
    h = jnp.maximum(out, 0.0)
    h = jnp.maximum(h @ params["mlp_w1"] + params["mlp_b1"], 0.0)
    return h @ params["mlp_w2"] + params["mlp_b2"]


if __name__ == "__main__":
    # small simplicial complex: N0 nodes, N1 edges, N2 triangles
    N0, N1, N2 = 8, 16, 8
    C_IN, HIDDEN, NUM_CLASSES = 8, 32, 4

    key = jax.random.PRNGKey(0)
    k_feat, k_b1, k_b2, k_params = jax.random.split(key, 4)
    kz0, kz1, kz2 = jax.random.split(k_feat, 3)

    z0 = jax.random.normal(kz0, (N0, C_IN), jnp.float32)
    z1 = jax.random.normal(kz1, (N1, C_IN), jnp.float32)
    z2 = jax.random.normal(kz2, (N2, C_IN), jnp.float32)

    # sparse-ish signed incidence matrices with entries in {-1, 0, +1}
    B1 = jnp.round(jnp.clip(jax.random.normal(k_b1, (N0, N1), jnp.float32), -1.2, 1.2))
    B2 = jnp.round(jnp.clip(jax.random.normal(k_b2, (N1, N2), jnp.float32), -1.2, 1.2))

    L0 = B1 @ B1.T          # node Laplacian (unused by classifier output)
    L1_d = B1.T @ B1        # lower edge Laplacian (symmetric)
    L1_u = B2 @ B2.T        # upper edge Laplacian (symmetric)
    L2 = B2.T @ B2          # triangle Laplacian (unused by classifier output)

    params = init_params(k_params, C_IN, HIDDEN, NUM_CLASSES)

    out = gsan_classifier_forward(params, z0, z1, z2, L0, L1_d, L1_u, L2, B1, B2)
    out = jax.block_until_ready(out)
    assert out.shape == (N1, NUM_CLASSES)
    assert bool(jnp.all(jnp.isfinite(out)))

    # validate against a pure-JAX reference of the PyTorch eval-mode forward
    ref = _reference_forward(params, z0, z1, z2, L1_d, L1_u, B1, B2)
    err = float(jnp.max(jnp.abs(out - ref)))
    scale = max(float(jnp.max(jnp.abs(ref))), 1.0)
    assert err <= 2e-2 * scale + 1e-3, f"kernel/reference mismatch: {err} (scale {scale})"

    print("KERNEL_OK")
</pallas_src>

<mosaic_0001>
module attributes {stable_mosaic.version = 11 : i64} {
  func.func @_prep_kernel(%arg0: memref<128x128xf32, #tpu.memory_space<vmem>>, %arg1: memref<128x8xf32, #tpu.memory_space<vmem>>, %arg2: memref<8x8xf32, #tpu.memory_space<vmem>>, %arg3: memref<8x8xf32, #tpu.memory_space<vmem>>, %arg4: memref<128x8xf32, #tpu.memory_space<vmem>>, %arg5: memref<128x8xf32, #tpu.memory_space<vmem>>, %arg6: memref<1xf32, #tpu.memory_space<smem>>, %arg7: memref<8x4xf32, #tpu.memory_space<vmem>>, %arg8: memref<8x32xf32, #tpu.memory_space<vmem>>, %arg9: memref<8x32xf32, #tpu.memory_space<vmem>>, %arg10: memref<8x32xf32, #tpu.memory_space<vmem>>, %arg11: memref<8x32xf32, #tpu.memory_space<vmem>>, %arg12: memref<8x32xf32, #tpu.memory_space<vmem>>, %arg13: memref<128x32xf32, #tpu.memory_space<vmem>>, %arg14: memref<128x32xbf16, #tpu.memory_space<vmem>>, %arg15: memref<128x32xbf16, #tpu.memory_space<vmem>>, %arg16: memref<128x4xf32, #tpu.memory_space<vmem>>) attributes {dimension_semantics = [], scalar_prefetch = 0 : i64, scratch_operands = 0 : i64, tpu.core_type = #tpu.core_type<tc>} {
    %c0 = arith.constant 0 : index
    %0 = memref.load %arg6[%c0] : memref<1xf32, #tpu.memory_space<smem>>
    %c0_0 = arith.constant 0 : index
    %c0_1 = arith.constant 0 : index
    %1 = vector.load %arg1[%c0_0, %c0_1] : memref<128x8xf32, #tpu.memory_space<vmem>>, vector<128x8xf32>
    %2 = tpu.iota {dimensions = array<i32: 0>} : vector<128x128xi32>
    %3 = tpu.iota {dimensions = array<i32: 1>} : vector<128x128xi32>
    %4 = arith.cmpi eq, %2, %3 : vector<128x128xi32>
    %cst = arith.constant 1.000000e+00 : f32
    %cst_2 = arith.constant 0.000000e+00 : f32
    %5 = vector.broadcast %cst : f32 to vector<128x128xf32>
    %6 = vector.broadcast %cst_2 : f32 to vector<128x128xf32>
    %7 = arith.select %4, %5, %6 : vector<128x128xi1>, vector<128x128xf32>
    %c0_3 = arith.constant 0 : index
    %c0_4 = arith.constant 0 : index
    %8 = vector.load %arg0[%c0_3, %c0_4] : memref<128x128xf32, #tpu.memory_space<vmem>>, vector<128x128xf32>
    %9 = vector.broadcast %0 : f32 to vector<128x128xf32>
    %10 = arith.mulf %9, %8 : vector<128x128xf32>
    %11 = arith.subf %7, %10 : vector<128x128xf32>
    %cst_5 = arith.constant dense<0.000000e+00> : vector<128x128xf32>
    %12 = tpu.matmul %11, %11, %cst_5 {dimension_numbers = #tpu.dot_dimension_numbers<[1], [0], [0], [1], [0, 0, 1, 1], [], []>} : vector<128x128xf32>, vector<128x128xf32>, vector<128x128xf32> -> vector<128x128xf32>
    %cst_6 = arith.constant dense<0.000000e+00> : vector<128x128xf32>
    %13 = tpu.matmul %12, %12, %cst_6 {dimension_numbers = #tpu.dot_dimension_numbers<[1], [0], [0], [1], [0, 0, 1, 1], [], []>} : vector<128x128xf32>, vector<128x128xf32>, vector<128x128xf32> -> vector<128x128xf32>
    %cst_7 = arith.constant dense<0.000000e+00> : vector<128x128xf32>
    %14 = tpu.matmul %13, %13, %cst_7 {dimension_numbers = #tpu.dot_dimension_numbers<[1], [0], [0], [1], [0, 0, 1, 1], [], []>} : vector<128x128xf32>, vector<128x128xf32>, vector<128x128xf32> -> vector<128x128xf32>
    %cst_8 = arith.constant dense<0.000000e+00> : vector<128x128xf32>
    %15 = tpu.matmul %14, %14, %cst_8 {dimension_numbers = #tpu.dot_dimension_numbers<[1], [0], [0], [1], [0, 0, 1, 1], [], []>} : vector<128x128xf32>, vector<128x128xf32>, vector<128x128xf32> -> vector<128x128xf32>
    %cst_9 = arith.constant dense<0.000000e+00> : vector<128x8xf32>
    %16 = tpu.matmul %15, %1, %cst_9 {dimension_numbers = #tpu.dot_dimension_numbers<[1], [0], [0], [1], [0, 0, 1, 1], [], []>} : vector<128x128xf32>, vector<128x8xf32>, vector<128x8xf32> -> vector<128x8xf32>
    %c0_10 = arith.constant 0 : index
    %c0_11 = arith.constant 0 : index
    %17 = vector.load %arg4[%c0_10, %c0_11] : memref<128x8xf32, #tpu.memory_space<vmem>>, vector<128x8xf32>
    %c0_12 = arith.constant 0 : index
    %c0_13 = arith.constant 0 : index
    %18 = vector.load %arg2[%c0_12, %c0_13] : memref<8x8xf32, #tpu.memory_space<vmem>>, vector<8x8xf32>
    %cst_14 = arith.constant dense<0.000000e+00> : vector<128x8xf32>
    %19 = tpu.matmul %17, %18, %cst_14 {dimension_numbers = #tpu.dot_dimension_numbers<[1], [0], [0], [1], [0, 0, 1, 1], [], []>} : vector<128x8xf32>, vector<8x8xf32>, vector<128x8xf32> -> vector<128x8xf32>
    %c0_15 = arith.constant 0 : index
    %c0_16 = arith.constant 0 : index
    %20 = vector.load %arg10[%c0_15, %c0_16] : memref<8x32xf32, #tpu.memory_space<vmem>>, vector<8x32xf32>
    %cst_17 = arith.constant dense<0.000000e+00> : vector<128x32xf32>
    %21 = tpu.matmul %19, %20, %cst_17 {dimension_numbers = #tpu.dot_dimension_numbers<[1], [0], [0], [1], [0, 0, 1, 1], [], []>} : vector<128x8xf32>, vector<8x32xf32>, vector<128x32xf32> -> vector<128x32xf32>
    %c0_18 = arith.constant 0 : index
    %c0_19 = arith.constant 0 : index
    %22 = vector.load %arg5[%c0_18, %c0_19] : memref<128x8xf32, #tpu.memory_space<vmem>>, vector<128x8xf32>
    %c0_20 = arith.constant 0 : index
    %c0_21 = arith.constant 0 : index
    %23 = vector.load %arg3[%c0_20, %c0_21] : memref<8x8xf32, #tpu.memory_space<vmem>>, vector<8x8xf32>
    %cst_22 = arith.constant dense<0.000000e+00> : vector<128x8xf32>
    %24 = tpu.matmul %22, %23, %cst_22 {dimension_numbers = #tpu.dot_dimension_numbers<[1], [0], [0], [1], [0, 0, 1, 1], [], []>} : vector<128x8xf32>, vector<8x8xf32>, vector<128x8xf32> -> vector<128x8xf32>
    %c0_23 = arith.constant 0 : index
    %c0_24 = arith.constant 0 : index
    %25 = vector.load %arg11[%c0_23, %c0_24] : memref<8x32xf32, #tpu.memory_space<vmem>>, vector<8x32xf32>
    %cst_25 = arith.constant dense<0.000000e+00> : vector<128x32xf32>
    %26 = tpu.matmul %24, %25, %cst_25 {dimension_numbers = #tpu.dot_dimension_numbers<[1], [0], [0], [1], [0, 0, 1, 1], [], []>} : vector<128x8xf32>, vector<8x32xf32>, vector<128x32xf32> -> vector<128x32xf32>
    %27 = arith.addf %21, %26 : vector<128x32xf32>
    %c0_26 = arith.constant 0 : index
    %c0_27 = arith.constant 0 : index
    %28 = vector.load %arg12[%c0_26, %c0_27] : memref<8x32xf32, #tpu.memory_space<vmem>>, vector<8x32xf32>
    %cst_28 = arith.constant dense<0.000000e+00> : vector<128x32xf32>
    %29 = tpu.matmul %16, %28, %cst_28 {dimension_numbers = #tpu.dot_dimension_numbers<[1], [0], [0], [1], [0, 0, 1, 1], [], []>} : vector<128x8xf32>, vector<8x32xf32>, vector<128x32xf32> -> vector<128x32xf32>
    %30 = arith.addf %27, %29 : vector<128x32xf32>
    %c0_29 = arith.constant 0 : index
    %c0_30 = arith.constant 0 : index
    %31 = vector.load %arg13[%c0_29, %c0_30] : memref<128x32xf32, #tpu.memory_space<vmem>>, vector<128x32xf32>
    tpu.vector_store %arg13[%c0_29, %c0_30], %30 {strides = array<i32>} : memref<128x32xf32, #tpu.memory_space<vmem>>, vector<128x32xf32>,
    %c0_31 = arith.constant 0 : index
    %c0_32 = arith.constant 0 : index
    %32 = vector.load %arg8[%c0_31, %c0_32] : memref<8x32xf32, #tpu.memory_space<vmem>>, vector<8x32xf32>
    %cst_33 = arith.constant dense<0.000000e+00> : vector<128x32xf32>
    %33 = tpu.matmul %1, %32, %cst_33 {dimension_numbers = #tpu.dot_dimension_numbers<[1], [0], [0], [1], [0, 0, 1, 1], [], []>} : vector<128x8xf32>, vector<8x32xf32>, vector<128x32xf32> -> vector<128x32xf32>
    %34 = arith.truncf %33 : vector<128x32xf32> to vector<128x32xbf16>
    %c0_34 = arith.constant 0 : index
    %c0_35 = arith.constant 0 : index
    %35 = vector.load %arg14[%c0_34, %c0_35] : memref<128x32xbf16, #tpu.memory_space<vmem>>, vector<128x32xbf16>
    tpu.vector_store %arg14[%c0_34, %c0_35], %34 {strides = array<i32>} : memref<128x32xbf16, #tpu.memory_space<vmem>>, vector<128x32xbf16>,
    %c0_36 = arith.constant 0 : index
    %c0_37 = arith.constant 0 : index
    %36 = vector.load %arg9[%c0_36, %c0_37] : memref<8x32xf32, #tpu.memory_space<vmem>>, vector<8x32xf32>
    %cst_38 = arith.constant dense<0.000000e+00> : vector<128x32xf32>
    %37 = tpu.matmul %1, %36, %cst_38 {dimension_numbers = #tpu.dot_dimension_numbers<[1], [0], [0], [1], [0, 0, 1, 1], [], []>} : vector<128x8xf32>, vector<8x32xf32>, vector<128x32xf32> -> vector<128x32xf32>
    %38 = arith.truncf %37 : vector<128x32xf32> to vector<128x32xbf16>
    %c0_39 = arith.constant 0 : index
    %c0_40 = arith.constant 0 : index
    %39 = vector.load %arg15[%c0_39, %c0_40] : memref<128x32xbf16, #tpu.memory_space<vmem>>, vector<128x32xbf16>
    tpu.vector_store %arg15[%c0_39, %c0_40], %38 {strides = array<i32>} : memref<128x32xbf16, #tpu.memory_space<vmem>>, vector<128x32xbf16>,
    %c0_41 = arith.constant 0 : index
    %c0_42 = arith.constant 0 : index
    %40 = vector.load %arg7[%c0_41, %c0_42] : memref<8x4xf32, #tpu.memory_space<vmem>>, vector<8x4xf32>
    %cst_43 = arith.constant dense<0.000000e+00> : vector<128x4xf32>
    %41 = tpu.matmul %1, %40, %cst_43 {dimension_numbers = #tpu.dot_dimension_numbers<[1], [0], [0], [1], [0, 0, 1, 1], [], []>} : vector<128x8xf32>, vector<8x4xf32>, vector<128x4xf32> -> vector<128x4xf32>
    %c0_44 = arith.constant 0 : index
    %c0_45 = arith.constant 0 : index
    %42 = vector.load %arg16[%c0_44, %c0_45] : memref<128x4xf32, #tpu.memory_space<vmem>>, vector<128x4xf32>
    tpu.vector_store %arg16[%c0_44, %c0_45], %41 {strides = array<i32>} : memref<128x4xf32, #tpu.memory_space<vmem>>, vector<128x4xf32>,
    return
  }
}

</mosaic_0001>

<bundles_post_ra>
// kernel: tpu_custom_call.1
= control target key start
LH: loop header
LB: loop body
LE: loop exit
PB: predicated region body
PF: predicated region fallthrough
CT: control target
= control target key end

     0   :  { %v66_v0 = vlaneseq  ;;  %v1648_v17 = vmov 0.0   ;;  %s2593_s0 = inlined_call_operand.vmem [shape: f32[128,128], index: 0, kind: input, shape index: {}]   ;;  %s2594_s6 = inlined_call_operand.<no memory space> [shape: f32[1], index: 6, kind: input, shape index: {}]   ;;  %s2595_s3 = inlined_call_operand.vmem [shape: f32[8,8], index: 3, kind: input, shape index: {}]   ;;  %s2596_s2 = inlined_call_operand.vmem [shape: f32[8,8], index: 2, kind: input, shape index: {}]   ;;  %s2597_s1 = inlined_call_operand.vmem [shape: f32[128,8], index: 1, kind: input, shape index: {}]   ;;  %s2598_s5 = inlined_call_operand.vmem [shape: f32[128,8], index: 5, kind: input, shape index: {}]   ;;  %s2599_s11 = inlined_call_operand.vmem [shape: f32[8,32], index: 11, kind: input, shape index: {}]   ;;  %s2600_s4 = inlined_call_operand.vmem [shape: f32[128,8], index: 4, kind: input, shape index: {}]   ;;  %s2601_s10 = inlined_call_operand.vmem [shape: f32[8,32], index: 10, kind: input, shape index: {}]   ;;  %s2602_s8 = inlined_call_operand.vmem [shape: f32[8,32], index: 8, kind: input, shape index: {}]   ;;  %s2603_s9 = inlined_call_operand.vmem [shape: f32[8,32], index: 9, kind: input, shape index: {}]   ;;  %s2604_s12 = inlined_call_operand.vmem [shape: f32[8,32], index: 12, kind: input, shape index: {}]   ;;  %s2605_s7 = inlined_call_operand.vmem [shape: f32[8,4], index: 7, kind: input, shape index: {}]   ;;  %s2606_s13 = inlined_call_operand.vmem [shape: f32[128,32], index: 13, kind: output, shape index: {0}]   ;;  %s2607_s14 = inlined_call_operand.vmem [shape: bf16[128,32], index: 14, kind: output, shape index: {1}]   ;;  %s2608_s15 = inlined_call_operand.vmem [shape: bf16[128,32], index: 15, kind: output, shape index: {2}]   ;;  %s2609_s16 = inlined_call_operand.vmem [shape: f32[128,4], index: 16, kind: output, shape index: {3}]  }
   0x1   :  { %2611 = sst [smem:[#allocation3_spill]] %s2593_s0  ;;  %v1740_v2 = vstv %s2594_s6 }
   0x2   :  { %s2612_s23 = sld [smem:[#allocation3_spill]]  ;;  %v1745_v4 = vshrl.u32 %v66_v0, 7  ;;  %v1747_v5 = vand.u32 127, %v66_v0 }
   0x4   :  { %v82_v9 = vadd.s32 120, %v1745_v4  ;;  %v81_v10 = vadd.s32 112, %v1745_v4  ;;  %v80_v11 = vadd.s32 104, %v1745_v4  ;;  %v79_v12 = vadd.s32 96, %v1745_v4 }
   0x5   :  { %v78_v15 = vadd.s32 88, %v1745_v4  ;;  %v77_v16 = vadd.s32 80, %v1745_v4  ;;  %v76_v25 = vadd.s32 72, %v1745_v4  ;;  %v75_v30 = vadd.s32 64, %v1745_v4 }
   0x6   :  { %vm100_vm0 = vcmp.eq.s32.totalorder %v82_v9, %v1747_v5  ;;  %vm99_vm1 = vcmp.eq.s32.totalorder %v81_v10, %v1747_v5  ;;  %vm98_vm2 = vcmp.eq.s32.totalorder %v80_v11, %v1747_v5  ;;  %vm97_vm3 = vcmp.eq.s32.totalorder %v79_v12, %v1747_v5 }
   0x7   :  { %v116_v18 = vsel %vm100_vm0, 1.0, %v1648_v17  ;;  %v115_v19 = vsel %vm99_vm1, 1.0, %v1648_v17  ;;  %v114_v20 = vsel %vm98_vm2, 1.0, %v1648_v17  ;;  %v113_v26 = vsel %vm97_vm3, 1.0, %v1648_v17 }
   0x8   :  { %v132_v1 = vld [vmem:[%s2612_s23 + $0x78] sm:$0xff]  ;;  %v131_v3 = vld [vmem:[%s2612_s23 + $0x70] sm:$0xff]  ;;  %v130_v6 = vld [vmem:[%s2612_s23 + $0x68] sm:$0xff]  ;;  %vm96_vm4 = vcmp.eq.s32.totalorder %v78_v15, %v1747_v5  ;;  %vm95_vm5 = vcmp.eq.s32.totalorder %v77_v16, %v1747_v5  ;;  %vm94_vm6 = vcmp.eq.s32.totalorder %v76_v25, %v1747_v5  ;;  %v74_v35 = vadd.s32 56, %v1745_v4 }
   0x9   :  { %v149_v7 = vmul.f32 %v1740_v2, %v132_v1  ;;  %v148_v8 = vmul.f32 %v1740_v2, %v131_v3  ;;  %v147_v13 = vmul.f32 %v1740_v2, %v130_v6  ;;  %v129_v14 = vld [vmem:[%s2612_s23 + $0x60] sm:$0xff]  ;;  %v128_v21 = vld [vmem:[%s2612_s23 + $0x58] sm:$0xff]  ;;  %v127_v27 = vld [vmem:[%s2612_s23 + $0x50] sm:$0xff]  ;;  %v112_v31 = vsel %vm96_vm4, 1.0, %v1648_v17 }
   0xa   :  { %v146_v24 = vmul.f32 %v1740_v2, %v129_v14  ;;  %v145_v29 = vmul.f32 %v1740_v2, %v128_v21  ;;  %v126_v32 = vld [vmem:[%s2612_s23 + $0x48] sm:$0xff]  ;;  %v144_v34 = vmul.f32 %v1740_v2, %v127_v27  ;;  %v111_v36 = vsel %vm95_vm5, 1.0, %v1648_v17  ;;  %v125_v37 = vld [vmem:[%s2612_s23 + $0x40] sm:$0xff]  ;;  %v124_v42 = vld [vmem:[%s2612_s23 + $0x38] sm:$0xff] }
   0xb   :  { %v1774_v22 = vsub.f32 %v116_v18, %v149_v7  ;;  %v1776_v23 = vsub.f32 %v115_v19, %v148_v8  ;;  %v1786_v28 = vsub.f32 %v114_v20, %v147_v13  ;;  %v143_v39 = vmul.f32 %v1740_v2, %v126_v32  ;;  %v123_v47 = vld [vmem:[%s2612_s23 + $0x30] sm:$0xff]  ;;  %v122_v52 = vld [vmem:[%s2612_s23 + $0x28] sm:$0xff]  ;;  %v121_v57 = vld [vmem:[%s2612_s23 + $0x20] sm:$0xff] }
   0xc   :  { %v1798_v33 = vsub.f32 %v113_v26, %v146_v24  ;;  %v1811_v38 = vsub.f32 %v112_v31, %v145_v29  ;;  %vm93_vm7 = vcmp.eq.s32.totalorder %v75_v30, %v1747_v5  ;;  %v73_v40 = vadd.s32 48, %v1745_v4  ;;  %v120_v62 = vld [vmem:[%s2612_s23 + $0x18] sm:$0xff]  ;;  %v119_v6 = vld [vmem:[%s2612_s23 + $0x10] sm:$0xff]  ;;  %v118_v10 = vld [vmem:[%s2612_s23 + $0x8] sm:$0xff] }
   0xd   :  { %1601 = vmatpush.msra.mxu3 %v1774_v22  ;;  %1600 = vmatpush.msra.mxu2 %v1774_v22  ;;  %v110_v41 = vsel %vm94_vm6, 1.0, %v1648_v17  ;;  %v1824_v43 = vsub.f32 %v111_v36, %v144_v34  ;;  %v142_v44 = vmul.f32 %v1740_v2, %v125_v37  ;;  %vm92_vm8 = vcmp.eq.s32.totalorder %v74_v35, %v1747_v5  ;;  %v117_v14 = vld [vmem:[%s2612_s23] sm:$0xff] }
   0xe   :  { %1599 = vmatpush.msra.mxu1 %v1774_v22  ;;  %166 = vmatpush.msra.mxu0 %v1774_v22  ;;  %v72_v45 = vadd.s32 40, %v1745_v4  ;;  %v109_v46 = vsel %vm93_vm7, 1.0, %v1648_v17  ;;  %v1837_v48 = vsub.f32 %v110_v41, %v143_v39  ;;  %v141_v49 = vmul.f32 %v1740_v2, %v124_v42 }
   0xf   :  { %1604 = vmatpush.msra.mxu3 %v1776_v23  ;;  %1603 = vmatpush.msra.mxu2 %v1776_v23  ;;  %vm91_vm9 = vcmp.eq.s32.totalorder %v73_v40, %v1747_v5  ;;  %v71_v50 = vadd.s32 32, %v1745_v4  ;;  %v108_v51 = vsel %vm92_vm8, 1.0, %v1648_v17  ;;  %v1850_v53 = vsub.f32 %v109_v46, %v142_v44 }
  0x10   :  { %1602 = vmatpush.msra.mxu1 %v1776_v23  ;;  %167 = vmatpush.msra.mxu0 %v1776_v23  ;;  %v140_v54 = vmul.f32 %v1740_v2, %v123_v47  ;;  %vm90_vm10 = vcmp.eq.s32.totalorder %v72_v45, %v1747_v5  ;;  %v70_v55 = vadd.s32 24, %v1745_v4  ;;  %v107_v56 = vsel %vm91_vm9, 1.0, %v1648_v17 }
  0x11   :  { %1607 = vmatpush.msra.mxu3 %v1786_v28  ;;  %1606 = vmatpush.msra.mxu2 %v1786_v28  ;;  %v1863_v58 = vsub.f32 %v108_v51, %v141_v49  ;;  %v139_v59 = vmul.f32 %v1740_v2, %v122_v52  ;;  %vm89_vm11 = vcmp.eq.s32.totalorder %v71_v50, %v1747_v5  ;;  %v69_v60 = vadd.s32 16, %v1745_v4 }
  0x12   :  { %1605 = vmatpush.msra.mxu1 %v1786_v28  ;;  %168 = vmatpush.msra.mxu0 %v1786_v28  ;;  %v106_v61 = vsel %vm90_vm10, 1.0, %v1648_v17  ;;  %v1876_v63 = vsub.f32 %v107_v56, %v140_v54  ;;  %v138_v0 = vmul.f32 %v1740_v2, %v121_v57  ;;  %vm88_vm12 = vcmp.eq.s32.totalorder %v70_v55, %v1747_v5 }
  0x13   :  { %1610 = vmatpush.msra.mxu3 %v1798_v33  ;;  %1609 = vmatpush.msra.mxu2 %v1798_v33  ;;  %v68_v1 = vadd.s32 8, %v1745_v4  ;;  %v105_v3 = vsel %vm89_vm11, 1.0, %v1648_v17  ;;  %v155_v7 = vsub.f32 %v106_v61, %v139_v59  ;;  %v137_v8 = vmul.f32 %v1740_v2, %v120_v62 }
  0x14   :  { %1608 = vmatpush.msra.mxu1 %v1798_v33  ;;  %169 = vmatpush.msra.mxu0 %v1798_v33  ;;  %vm87_vm13 = vcmp.eq.s32.totalorder %v69_v60, %v1747_v5  ;;  %v104_v9 = vsel %vm88_vm12, 1.0, %v1648_v17  ;;  %v154_v11 = vsub.f32 %v105_v3, %v138_v0  ;;  %v136_v12 = vmul.f32 %v1740_v2, %v119_v6  ;;  %v639_v6 = vld [vmem:[%s2595_s3] sm:$0xff] }
  0x15   :  { %1613 = vmatpush.msra.mxu3 %v1811_v38  ;;  %1612 = vmatpush.msra.mxu2 %v1811_v38  ;;  %vm86_vm14 = vcmp.eq.s32.totalorder %v68_v1, %v1747_v5  ;;  %v103_v13 = vsel %vm87_vm13, 1.0, %v1648_v17  ;;  %v153_v15 = vsub.f32 %v104_v9, %v137_v8  ;;  %v135_v16 = vmul.f32 %v1740_v2, %v118_v10  ;;  %v507_v8 = vld [vmem:[%s2596_s2] sm:$0xff]  ;;  %v1949_v9 = vld [vmem:[%s2597_s1 + $0x78] sm:$0xff]  ;;  %v1954_v10 = vld [vmem:[%s2597_s1 + $0x70] sm:$0xff] }
  0x16   :  { %1611 = vmatpush.msra.mxu1 %v1811_v38  ;;  %170 = vmatpush.msra.mxu0 %v1811_v38  ;;  %vm85_vm15 = vcmp.eq.s32.totalorder %v1745_v4, %v1747_v5  ;;  %v102_v18 = vsel %vm86_vm14, 1.0, %v1648_v17  ;;  %v152_v19 = vsub.f32 %v103_v13, %v136_v12  ;;  %v134_v20 = vmul.f32 %v1740_v2, %v117_v14  ;;  %v1966_v12 = vld [vmem:[%s2597_s1 + $0x60] sm:$0xff]  ;;  %v1972_v13 = vld [vmem:[%s2597_s1 + $0x58] sm:$0xff]  ;;  %v1978_v14 = vld [vmem:[%s2597_s1 + $0x50] sm:$0xff] }
  0x17   :  { %1616 = vmatpush.msra.mxu3 %v1824_v43  ;;  %1615 = vmatpush.msra.mxu2 %v1824_v43  ;;  %v101_v21 = vsel %vm85_vm15, 1.0, %v1648_v17  ;;  %v151_v24 = vsub.f32 %v102_v18, %v135_v16  ;;  %v1990_v16 = vld [vmem:[%s2597_s1 + $0x40] sm:$0xff]  ;;  %v1996_v18 = vld [vmem:[%s2597_s1 + $0x38] sm:$0xff]  ;;  %vm508_vm0 = vcmask 64512   ;;  %vm1110_vm1 = vcmask 261120  }
  0x18   :  { %1614 = vmatpush.msra.mxu1 %v1824_v43  ;;  %171 = vmatpush.msra.mxu0 %v1824_v43  ;;  %v150_v4 = vsub.f32 %v101_v21, %v134_v20  ;;  %v623_v20 = vld [vmem:[%s2598_s5] sm:$0xff]  ;;  %v2013_v21 = vld [vmem:[%s2597_s1 + $0x28] sm:$0xff]  ;;  %vm1257_vm2 = vcmask 257024   ;;  %vm1438_vm3 = vcmask 31744  }
  0x19   :  { %1619 = vmatpush.msra.mxu3 %v1837_v48  ;;  %1618 = vmatpush.msra.mxu2 %v1837_v48 }
  0x1a   :  { %1617 = vmatpush.msra.mxu1 %v1837_v48  ;;  %172 = vmatpush.msra.mxu0 %v1837_v48 }
  0x1b   :  { %1622 = vmatpush.msra.mxu3 %v1850_v53  ;;  %1621 = vmatpush.msra.mxu2 %v1850_v53 }
  0x1c   :  { %1620 = vmatpush.msra.mxu1 %v1850_v53  ;;  %173 = vmatpush.msra.mxu0 %v1850_v53 }
  0x1d   :  { %1625 = vmatpush.msra.mxu3 %v1863_v58  ;;  %1624 = vmatpush.msra.mxu2 %v1863_v58 }
  0x1e   :  { %1623 = vmatpush.msra.mxu1 %v1863_v58  ;;  %174 = vmatpush.msra.mxu0 %v1863_v58 }
  0x1f   :  { %1628 = vmatpush.msra.mxu3 %v1876_v63  ;;  %1627 = vmatpush.msra.mxu2 %v1876_v63 }
  0x20   :  { %1626 = vmatpush.msra.mxu1 %v1876_v63  ;;  %175 = vmatpush.msra.mxu0 %v1876_v63 }
  0x21   :  { %1631 = vmatpush.msra.mxu3 %v155_v7  ;;  %1630 = vmatpush.msra.mxu2 %v155_v7 }
  0x22   :  { %1629 = vmatpush.msra.mxu1 %v155_v7  ;;  %176 = vmatpush.msra.mxu0 %v155_v7 }
  0x23   :  { %1634 = vmatpush.msra.mxu3 %v154_v11  ;;  %1633 = vmatpush.msra.mxu2 %v154_v11 }
  0x24   :  { %1632 = vmatpush.msra.mxu1 %v154_v11  ;;  %177 = vmatpush.msra.mxu0 %v154_v11 }
  0x25   :  { %1637 = vmatpush.msra.mxu3 %v153_v15  ;;  %1636 = vmatpush.msra.mxu2 %v153_v15 }
  0x26   :  { %1635 = vmatpush.msra.mxu1 %v153_v15  ;;  %178 = vmatpush.msra.mxu0 %v153_v15 }
  0x27   :  { %1640 = vmatpush.msra.mxu3 %v152_v19  ;;  %1639 = vmatpush.msra.mxu2 %v152_v19 }
  0x28   :  { %1638 = vmatpush.msra.mxu1 %v152_v19  ;;  %179 = vmatpush.msra.mxu0 %v152_v19 }
  0x29   :  { %1643 = vmatpush.msra.mxu3 %v151_v24  ;;  %1642 = vmatpush.msra.mxu2 %v151_v24 }
  0x2a   :  { %1641 = vmatpush.msra.mxu1 %v151_v24  ;;  %180 = vmatpush.msra.mxu0 %v151_v24 }
  0x2b   :  { %1646 = vmatpush.msra.mxu3 %v150_v4  ;;  %1645 = vmatpush.msra.mxu2 %v150_v4 }
  0x2c   :  { %218 = vmatmul.f32.vlgmr.msra.gmra.mxu3 %v1798_v33  ;;  %206 = vmatmul.f32.vlgmr.msra.gmra.mxu2 %v1850_v53 }
  0x2d   :  { %1644 = vmatpush.msra.mxu1 %v150_v4  ;;  %181 = vmatpush.msra.mxu0 %v150_v4 }
  0x2e   :  { %194 = vmatmul.f32.vlgmr.msra.gmra.mxu1 %v154_v11  ;;  %182 = vmatmul.f32.vlgmr.msra.gmra.mxu0 %v150_v4  ;;  %v1961_v11 = vld [vmem:[%s2597_s1 + $0x68] sm:$0xff]  ;;  %v753_v4 = vld [vmem:[%s2599_s11] sm:$0xff] }
  0x2f   :  { %426 = vmatpush.msrb.mxu0 %v1949_v9 }
  0x31   :  { %427 = vmatpush.msrb.mxu0 %v1954_v10 }
  0x33   :  { %428 = vmatpush.msrb.mxu0 %v1961_v11 }
  0x34   :  { %221 = vmatmul.f32.gmra.mxu3 %v1786_v28  ;;  %209 = vmatmul.f32.gmra.mxu2 %v1837_v48 }
  0x35   :  { %429 = vmatpush.msrb.mxu0 %v1966_v12 }
  0x36   :  { %197 = vmatmul.f32.gmra.mxu1 %v155_v7  ;;  %185 = vmatmul.f32.gmra.mxu0 %v151_v24  ;;  %v2019_v24 = vld [vmem:[%s2597_s1 + $0x20] sm:$0xff] }
  0x37   :  { %430 = vmatpush.msrb.mxu0 %v1972_v13 }
  0x39   :  { %431 = vmatpush.msrb.mxu0 %v1978_v14 }
  0x3c   :  { %224 = vmatmul.f32.gmra.mxu3 %v1776_v23  ;;  %212 = vmatmul.f32.gmra.mxu2 %v1824_v43 }
  0x3e   :  { %200 = vmatmul.f32.gmra.mxu1 %v1876_v63  ;;  %188 = vmatmul.f32.gmra.mxu0 %v152_v19  ;;  %v2002_v19 = vld [vmem:[%s2597_s1 + $0x30] sm:$0xff] }
  0x44   :  { %227 = vmatmul.f32.gmra.mxu3 %v1774_v22  ;;  %215 = vmatmul.f32.gmra.mxu2 %v1811_v38 }
  0x46   :  { %203 = vmatmul.f32.gmra.mxu1 %v1863_v58  ;;  %191 = vmatmul.f32.gmra.mxu0 %v153_v15  ;;  %v1985_v15 = vld [vmem:[%s2597_s1 + $0x48] sm:$0xff] }
  0x47   :  { %432 = vmatpush.msrb.mxu0 %v1985_v15 }
  0x49   :  { %433 = vmatpush.msrb.mxu0 %v1990_v16 }
  0x4b   :  { %434 = vmatpush.msrb.mxu0 %v1996_v18 }
  0x4d   :  { %435 = vmatpush.msrb.mxu0 %v2002_v19 }
  0x4f   :  { %436 = vmatpush.msrb.mxu0 %v2013_v21 }
  0x51   :  { %437 = vmatpush.msrb.mxu0 %v2019_v24 }
  0xab   :  { %v195_v25 = vpop.f32.mrf.mxu1  ;;  %v183_v28 = vpop.f32.mrf.mxu0 }
  0xaf   :  { %v219_v2 = vpop.f32.mrf.mxu3  ;;  %v207_v5 = vpop.f32.mrf.mxu2 }
  0xb3   :  { %v198_v23 = vpop.f32.mrf.mxu1  ;;  %v186_v31 = vpop.f32.mrf.mxu0 }
  0xb7   :  { %v222_v17 = vpop.f32.mrf.mxu3  ;;  %v210_v26 = vpop.f32.mrf.mxu2 }
  0xbb   :  { %v201_v32 = vpop.f32.mrf.mxu1  ;;  %v189_v33 = vpop.f32.mrf.mxu0 }
  0xbf   :  { %v225_v27 = vpop.f32.mrf.mxu3  ;;  %v213_v29 = vpop.f32.mrf.mxu2 }
  0xc3   :  { %v204_v34 = vpop.f32.mrf.mxu1  ;;  %v192_v35 = vpop.f32.mrf.mxu0 }
  0xc7   :  { %v228_v30 = vpop.f32.mrf.mxu3  ;;  %v216_v22 = vpop.f32.mrf.mxu2 }
  0xc8   :  { %231 = vmatpush.msrb.mxu1 %v228_v30 }
  0xca   :  { %232 = vmatpush.msrb.mxu1 %v225_v27 }
  0xcc   :  { %233 = vmatpush.msrb.mxu1 %v222_v17 }
  0xce   :  { %234 = vmatpush.msrb.mxu1 %v219_v2 }
  0xd0   :  { %235 = vmatpush.msrb.mxu1 %v216_v22 }
  0xd2   :  { %236 = vmatpush.msrb.mxu1 %v213_v29 }
  0xd4   :  { %237 = vmatpush.msrb.mxu1 %v210_v26 }
  0xd6   :  { %238 = vmatpush.msrb.mxu1 %v207_v5 }
  0xd8   :  { %239 = vmatpush.msrb.mxu1 %v204_v34 }
  0xda   :  { %240 = vmatpush.msrb.mxu1 %v201_v32 }
  0xdc   :  { %241 = vmatpush.msrb.mxu1 %v198_v23 }
  0xde   :  { %242 = vmatpush.msrb.mxu1 %v195_v25 }
  0xe0   :  { %243 = vmatpush.msrb.mxu1 %v192_v35 }
  0xe2   :  { %244 = vmatpush.msrb.mxu1 %v189_v33 }
  0xe4   :  { %245 = vmatpush.msrb.mxu1 %v186_v31 }
  0xe6   :  { %246 = vmatpush.msrb.mxu1 %v183_v28 }
  0xe7   :  { %247 = vmatmul.f32.vlgmr.msrb.gmra.mxu1 %v183_v28  ;;  %v622_v28 = vld [vmem:[%s2601_s10] sm:$0xff] }
  0xe8   :  { %572 = vmatpush.msra.mxu1 %v507_v8  ;;  %v1127_v8 = vld [vmem:[%s2602_s8] sm:$0xff] }
  0xef   :  { %250 = vmatmul.f32.gmra.mxu1 %v186_v31  ;;  %v626_v31 = vld [vmem:[%s2598_s5 + $0x18] sm:$0xff] }
  0xf7   :  { %253 = vmatmul.f32.gmra.mxu1 %v189_v33  ;;  %v495_v33 = vld [vmem:[%s2600_s4 + $0x20] sm:$0xff] }
  0xff   :  { %256 = vmatmul.f32.gmra.mxu1 %v192_v35 }
 0x107   :  { %259 = vmatmul.f32.gmra.mxu1 %v195_v25  ;;  %v624_v25 = vld [vmem:[%s2598_s5 + $0x8] sm:$0xff] }
 0x10f   :  { %262 = vmatmul.f32.gmra.mxu1 %v198_v23  ;;  %v492_v23 = vld [vmem:[%s2600_s4 + $0x8] sm:$0xff] }
 0x117   :  { %265 = vmatmul.f32.gmra.mxu1 %v201_v32  ;;  %v494_v32 = vld [vmem:[%s2600_s4 + $0x18] sm:$0xff] }
 0x11f   :  { %268 = vmatmul.f32.gmra.mxu1 %v204_v34  ;;  %v628_v34 = vld [vmem:[%s2598_s5 + $0x28] sm:$0xff] }
 0x127   :  { %271 = vmatmul.f32.gmra.mxu1 %v207_v5  ;;  %v491_v5 = vld [vmem:[%s2600_s4] sm:$0xff] }
 0x12f   :  { %274 = vmatmul.f32.gmra.mxu1 %v210_v26  ;;  %v2047_v26 = vld [vmem:[%s2597_s1 + $0x8] sm:$0xff] }
 0x137   :  { %277 = vmatmul.f32.gmra.mxu1 %v213_v29  ;;  %v625_v29 = vld [vmem:[%s2598_s5 + $0x10] sm:$0xff] }
 0x13f   :  { %280 = vmatmul.f32.gmra.mxu1 %v216_v22  ;;  %v627_v22 = vld [vmem:[%s2598_s5 + $0x20] sm:$0xff] }
 0x147   :  { %283 = vmatmul.f32.gmra.mxu1 %v219_v2  ;;  %v2028_v2 = vld [vmem:[%s2597_s1 + $0x18] sm:$0xff] }
 0x148   :  { %438 = vmatpush.msrb.mxu0 %v2028_v2 }
 0x14f   :  { %286 = vmatmul.f32.gmra.mxu1 %v222_v17  ;;  %v2038_v17 = vld [vmem:[%s2597_s1 + $0x10] sm:$0xff] }
 0x150   :  { %439 = vmatpush.msrb.mxu0 %v2038_v17 }
 0x152   :  { %440 = vmatpush.msrb.mxu0 %v2047_v26 }
 0x157   :  { %289 = vmatmul.f32.gmra.mxu1 %v225_v27  ;;  %v2056_v27 = vld [vmem:[%s2597_s1] sm:$0xff] }
 0x158   :  { %441 = vmatpush.msrb.mxu0 %v2056_v27 }
 0x15a   :  { %930 = vmatpush.msra.mxu0 %v622_v28 }
 0x15f   :  { %292 = vmatmul.f32.gmra.mxu1 %v228_v30  ;;  %v493_v30 = vld [vmem:[%s2600_s4 + $0x10] sm:$0xff] }
 0x164   :  { %v248_v36 = vpop.f32.mrf.mxu1 }
 0x167   :  { %1471 = vmatmul.msk.f32.vlgmr.msra.gmra.mxu1 %vm508_vm0, %v491_v5  ;;  %v980_v5 = vld [vmem:[%s2604_s12] sm:$0xff] }
 0x168   :  { %1044 = vmatpush.msrb.mxu1 %v980_v5 }
 0x16c   :  { %v251_v37 = vpop.f32.mrf.mxu1 }
 0x16f   :  { %1472 = vmatmul.msk.f32.gmra.mxu1 %vm508_vm0, %v492_v23  ;;  %v1372_v23 = vld [vmem:[%s2605_s7] sm:$0xff] }
 0x174   :  { %v254_v38 = vpop.f32.mrf.mxu1 }
 0x177   :  { %1473 = vmatmul.msk.f32.gmra.mxu1 %vm508_vm0, %v493_v30 }
 0x17c   :  { %v257_v39 = vpop.f32.mrf.mxu1 }
 0x17f   :  { %1474 = vmatmul.msk.f32.gmra.mxu1 %vm508_vm0, %v494_v32 }
 0x184   :  { %v260_v40 = vpop.f32.mrf.mxu1 }
 0x187   :  { %1475 = vmatmul.msk.f32.gmra.mxu1 %vm508_vm0, %v495_v33 }
 0x18c   :  { %v263_v41 = vpop.f32.mrf.mxu1 }
 0x194   :  { %v266_v42 = vpop.f32.mrf.mxu1 }
 0x19c   :  { %v269_v43 = vpop.f32.mrf.mxu1 }
 0x1a4   :  { %v272_v44 = vpop.f32.mrf.mxu1 }
 0x1ac   :  { %v275_v45 = vpop.f32.mrf.mxu1 }
 0x1b4   :  { %v278_v46 = vpop.f32.mrf.mxu1 }
 0x1bc   :  { %v281_v47 = vpop.f32.mrf.mxu1 }
 0x1c4   :  { %v284_v48 = vpop.f32.mrf.mxu1 }
 0x1cc   :  { %v287_v49 = vpop.f32.mrf.mxu1 }
 0x1d4   :  { %v290_v50 = vpop.f32.mrf.mxu1 }
 0x1dc   :  { %v293_v51 = vpop.f32.mrf.mxu1 }
 0x1dd   :  { %296 = vmatpush.msrb.mxu2 %v293_v51 }
 0x1df   :  { %297 = vmatpush.msrb.mxu2 %v290_v50 }
 0x1e1   :  { %298 = vmatpush.msrb.mxu2 %v287_v49 }
 0x1e3   :  { %299 = vmatpush.msrb.mxu2 %v284_v48 }
 0x1e5   :  { %300 = vmatpush.msrb.mxu2 %v281_v47 }
 0x1e7   :  { %301 = vmatpush.msrb.mxu2 %v278_v46 }
 0x1e9   :  { %302 = vmatpush.msrb.mxu2 %v275_v45 }
 0x1eb   :  { %303 = vmatpush.msrb.mxu2 %v272_v44 }
 0x1ed   :  { %304 = vmatpush.msrb.mxu2 %v269_v43 }
 0x1ef   :  { %305 = vmatpush.msrb.mxu2 %v266_v42 }
 0x1f1   :  { %306 = vmatpush.msrb.mxu2 %v263_v41 }
 0x1f3   :  { %307 = vmatpush.msrb.mxu2 %v260_v40 }
 0x1f5   :  { %308 = vmatpush.msrb.mxu2 %v257_v39 }
 0x1f7   :  { %309 = vmatpush.msrb.mxu2 %v254_v38 }
 0x1f9   :  { %310 = vmatpush.msrb.mxu2 %v251_v37 }
 0x1fb   :  { %311 = vmatpush.msrb.mxu2 %v248_v36 }
 0x1fc   :  { %312 = vmatmul.f32.vlgmr.msrb.gmra.mxu2 %v248_v36  ;;  %v496_v36 = vld [vmem:[%s2600_s4 + $0x28] sm:$0xff] }
 0x1fd   :  { %703 = vmatpush.msra.mxu2 %v639_v6  ;;  %1476 = vmatmul.msk.f32.gmra.mxu1 %vm508_vm0, %v496_v36 }
 0x1ff   :  { %1191 = vmatpush.msrb.mxu2 %v1127_v8 }
 0x204   :  { %315 = vmatmul.f32.gmra.mxu2 %v251_v37  ;;  %v629_v37 = vld [vmem:[%s2598_s5 + $0x30] sm:$0xff] }
 0x20c   :  { %318 = vmatmul.f32.gmra.mxu2 %v254_v38 }
 0x214   :  { %321 = vmatmul.f32.gmra.mxu2 %v257_v39  ;;  %v497_v39 = vld [vmem:[%s2600_s4 + $0x30] sm:$0xff] }
 0x215   :  { %1477 = vmatmul.msk.f32.gmra.mxu1 %vm508_vm0, %v497_v39 }
 0x21c   :  { %324 = vmatmul.f32.gmra.mxu2 %v260_v40  ;;  %v630_v40 = vld [vmem:[%s2598_s5 + $0x38] sm:$0xff] }
 0x224   :  { %327 = vmatmul.f32.gmra.mxu2 %v263_v41 }
 0x22c   :  { %330 = vmatmul.f32.gmra.mxu2 %v266_v42  ;;  %v498_v42 = vld [vmem:[%s2600_s4 + $0x38] sm:$0xff] }
 0x22d   :  { %1478 = vmatmul.msk.f32.gmra.mxu1 %vm508_vm0, %v498_v42 }
 0x234   :  { %333 = vmatmul.f32.gmra.mxu2 %v269_v43  ;;  %v631_v43 = vld [vmem:[%s2598_s5 + $0x40] sm:$0xff] }
 0x23c   :  { %336 = vmatmul.f32.gmra.mxu2 %v272_v44 }
 0x244   :  { %339 = vmatmul.f32.gmra.mxu2 %v275_v45  ;;  %v499_v45 = vld [vmem:[%s2600_s4 + $0x40] sm:$0xff] }
 0x245   :  { %1479 = vmatmul.msk.f32.gmra.mxu1 %vm508_vm0, %v499_v45 }
 0x24c   :  { %342 = vmatmul.f32.gmra.mxu2 %v278_v46  ;;  %v632_v46 = vld [vmem:[%s2598_s5 + $0x48] sm:$0xff] }
 0x254   :  { %345 = vmatmul.f32.gmra.mxu2 %v281_v47 }
 0x25c   :  { %348 = vmatmul.f32.gmra.mxu2 %v284_v48  ;;  %v500_v48 = vld [vmem:[%s2600_s4 + $0x48] sm:$0xff] }
 0x25d   :  { %1480 = vmatmul.msk.f32.gmra.mxu1 %vm508_vm0, %v500_v48 }
 0x264   :  { %351 = vmatmul.f32.gmra.mxu2 %v287_v49  ;;  %v633_v49 = vld [vmem:[%s2598_s5 + $0x50] sm:$0xff] }
 0x26c   :  { %354 = vmatmul.f32.gmra.mxu2 %v290_v50 }
 0x274   :  { %357 = vmatmul.f32.gmra.mxu2 %v293_v51  ;;  %v501_v51 = vld [vmem:[%s2600_s4 + $0x50] sm:$0xff] }
 0x275   :  { %1481 = vmatmul.msk.f32.gmra.mxu1 %vm508_vm0, %v501_v51 }
 0x27c   :  { %1487 = vmatmul.msk.f32.vlgmr.msra.gmra.mxu2 %vm508_vm0, %v623_v20  ;;  %v1274_v20 = vld [vmem:[%s2603_s9] sm:$0xff] }
 0x27f   :  { %v313_v52 = vpop.f32.mrf.mxu2 }
 0x284   :  { %1488 = vmatmul.msk.f32.gmra.mxu2 %vm508_vm0, %v624_v25 }
 0x287   :  { %v316_v53 = vpop.f32.mrf.mxu2 }
 0x28c   :  { %1489 = vmatmul.msk.f32.gmra.mxu2 %vm508_vm0, %v625_v29 }
 0x28f   :  { %v319_v54 = vpop.f32.mrf.mxu2 }
 0x294   :  { %1490 = vmatmul.msk.f32.gmra.mxu2 %vm508_vm0, %v626_v31 }
 0x297   :  { %v322_v55 = vpop.f32.mrf.mxu2 }
 0x29c   :  { %1491 = vmatmul.msk.f32.gmra.mxu2 %vm508_vm0, %v627_v22 }
 0x29f   :  { %v325_v56 = vpop.f32.mrf.mxu2 }
 0x2a4   :  { %1492 = vmatmul.msk.f32.gmra.mxu2 %vm508_vm0, %v628_v34 }
 0x2a7   :  { %v328_v57 = vpop.f32.mrf.mxu2 }
 0x2ac   :  { %1493 = vmatmul.msk.f32.gmra.mxu2 %vm508_vm0, %v629_v37 }
 0x2af   :  { %v331_v58 = vpop.f32.mrf.mxu2 }
 0x2b4   :  { %1494 = vmatmul.msk.f32.gmra.mxu2 %vm508_vm0, %v630_v40 }
 0x2b7   :  { %v334_v59 = vpop.f32.mrf.mxu2 }
 0x2bc   :  { %1495 = vmatmul.msk.f32.gmra.mxu2 %vm508_vm0, %v631_v43 }
 0x2bf   :  { %v337_v60 = vpop.f32.mrf.mxu2 }
 0x2c4   :  { %1496 = vmatmul.msk.f32.gmra.mxu2 %vm508_vm0, %v632_v46 }
 0x2c7   :  { %v340_v61 = vpop.f32.mrf.mxu2 }
 0x2cc   :  { %1497 = vmatmul.msk.f32.gmra.mxu2 %vm508_vm0, %v633_v49 }
 0x2cf   :  { %v343_v62 = vpop.f32.mrf.mxu2 }
 0x2d7   :  { %v1925_v63 = vpop.f32.mrf.mxu2 }
 0x2df   :  { %v1927_v0 = vpop.f32.mrf.mxu2 }
 0x2e7   :  { %v1929_v1 = vpop.f32.mrf.mxu2 }
 0x2ef   :  { %v1931_v3 = vpop.f32.mrf.mxu2 }
 0x2f7   :  { %v1936_v7 = vpop.f32.mrf.mxu2 }
 0x2f8   :  { %361 = vmatpush.msrb.mxu3 %v1936_v7 }
 0x2fa   :  { %362 = vmatpush.msrb.mxu3 %v1931_v3 }
 0x2fc   :  { %363 = vmatpush.msrb.mxu3 %v1929_v1 }
 0x2fe   :  { %364 = vmatpush.msrb.mxu3 %v1927_v0 }
 0x300   :  { %365 = vmatpush.msrb.mxu3 %v1925_v63 }
 0x302   :  { %366 = vmatpush.msrb.mxu3 %v343_v62 }
 0x304   :  { %367 = vmatpush.msrb.mxu3 %v340_v61 }
 0x306   :  { %368 = vmatpush.msrb.mxu3 %v337_v60 }
 0x308   :  { %369 = vmatpush.msrb.mxu3 %v334_v59 }
 0x30a   :  { %370 = vmatpush.msrb.mxu3 %v331_v58 }
 0x30c   :  { %371 = vmatpush.msrb.mxu3 %v328_v57 }
 0x30e   :  { %372 = vmatpush.msrb.mxu3 %v325_v56 }
 0x310   :  { %373 = vmatpush.msrb.mxu3 %v322_v55 }
 0x312   :  { %374 = vmatpush.msrb.mxu3 %v319_v54 }
 0x314   :  { %375 = vmatpush.msrb.mxu3 %v316_v53 }
 0x316   :  { %376 = vmatpush.msrb.mxu3 %v313_v52 }
 0x317   :  { %377 = vmatmul.f32.vlgmr.msrb.gmra.mxu3 %v313_v52  ;;  %v634_v52 = vld [vmem:[%s2598_s5 + $0x58] sm:$0xff] }
 0x318   :  { %817 = vmatpush.msra.mxu3 %v753_v4  ;;  %1498 = vmatmul.msk.f32.gmra.mxu2 %vm508_vm0, %v634_v52  ;;  %v574_v4 = vpop.f32.mrf.mxu1 }
 0x31a   :  { %1290 = vmatpush.msrb.mxu3 %v1274_v20 }
 0x31f   :  { %380 = vmatmul.f32.gmra.mxu3 %v316_v53 }
 0x320   :  { %v577_v29 = vpop.f32.mrf.mxu1 }
 0x327   :  { %383 = vmatmul.f32.gmra.mxu3 %v319_v54  ;;  %v502_v54 = vld [vmem:[%s2600_s4 + $0x58] sm:$0xff] }
 0x328   :  { %1482 = vmatmul.msk.f32.gmra.mxu1 %vm508_vm0, %v502_v54  ;;  %v580_v32 = vpop.f32.mrf.mxu1 }
 0x32f   :  { %386 = vmatmul.f32.gmra.mxu3 %v322_v55  ;;  %v635_v55 = vld [vmem:[%s2598_s5 + $0x60] sm:$0xff] }
 0x330   :  { %1499 = vmatmul.msk.f32.gmra.mxu2 %vm508_vm0, %v635_v55  ;;  %v583_v36 = vpop.f32.mrf.mxu1 }
 0x337   :  { %389 = vmatmul.f32.gmra.mxu3 %v325_v56 }
 0x338   :  { %v586_v39 = vpop.f32.mrf.mxu1 }
 0x33f   :  { %392 = vmatmul.f32.gmra.mxu3 %v328_v57  ;;  %v503_v57 = vld [vmem:[%s2600_s4 + $0x60] sm:$0xff] }
 0x340   :  { %1483 = vmatmul.msk.f32.gmra.mxu1 %vm508_vm0, %v503_v57  ;;  %v589_v43 = vpop.f32.mrf.mxu1 }
 0x347   :  { %395 = vmatmul.f32.gmra.mxu3 %v331_v58  ;;  %v636_v58 = vld [vmem:[%s2598_s5 + $0x68] sm:$0xff] }
 0x348   :  { %1500 = vmatmul.msk.f32.gmra.mxu2 %vm508_vm0, %v636_v58  ;;  %v592_v46 = vpop.f32.mrf.mxu1 }
 0x34f   :  { %398 = vmatmul.f32.gmra.mxu3 %v334_v59 }
 0x357   :  { %401 = vmatmul.f32.gmra.mxu3 %v337_v60  ;;  %v504_v60 = vld [vmem:[%s2600_s4 + $0x68] sm:$0xff] }
 0x358   :  { %1484 = vmatmul.msk.f32.gmra.mxu1 %vm508_vm0, %v504_v60 }
 0x35f   :  { %404 = vmatmul.f32.gmra.mxu3 %v340_v61  ;;  %v637_v61 = vld [vmem:[%s2598_s5 + $0x70] sm:$0xff] }
 0x360   :  { %1501 = vmatmul.msk.f32.gmra.mxu2 %vm508_vm0, %v637_v61 }
 0x367   :  { %407 = vmatmul.f32.gmra.mxu3 %v343_v62 }
 0x36f   :  { %410 = vmatmul.f32.gmra.mxu3 %v1925_v63  ;;  %v505_v63 = vld [vmem:[%s2600_s4 + $0x70] sm:$0xff] }
 0x370   :  { %1485 = vmatmul.msk.f32.gmra.mxu1 %vm508_vm0, %v505_v63 }
 0x377   :  { %413 = vmatmul.f32.gmra.mxu3 %v1927_v0  ;;  %v638_v0 = vld [vmem:[%s2598_s5 + $0x78] sm:$0xff] }
 0x378   :  { %1502 = vmatmul.msk.f32.gmra.mxu2 %vm508_vm0, %v638_v0 }
 0x37f   :  { %416 = vmatmul.f32.gmra.mxu3 %v1929_v1 }
 0x380   :  { %1551 = vmatmul.msk.f32.vlgmr.msrb.gmra.mxu2 %vm508_vm0, %v2056_v27 }
 0x387   :  { %419 = vmatmul.f32.gmra.mxu3 %v1931_v3  ;;  %v506_v3 = vld [vmem:[%s2600_s4 + $0x78] sm:$0xff] }
 0x388   :  { %1486 = vmatmul.msk.f32.gmra.mxu1 %vm508_vm0, %v506_v3  ;;  %1552 = vmatmul.msk.f32.gmra.mxu2 %vm508_vm0, %v2047_v26 }
 0x38f   :  { %422 = vmatmul.f32.gmra.mxu3 %v1936_v7  ;;  %v705_v7 = vpop.f32.mrf.mxu2 }
 0x390   :  { %1553 = vmatmul.msk.f32.gmra.mxu2 %vm508_vm0, %v2038_v17 }
 0x397   :  { %1503 = vmatmul.msk.f32.vlgmr.msra.gmra.mxu3 %vm508_vm0, %v705_v7  ;;  %v708_v28 = vpop.f32.mrf.mxu2 }
 0x398   :  { %1554 = vmatmul.msk.f32.gmra.mxu2 %vm508_vm0, %v2028_v2 }
 0x39a   :  { %v378_v35 = vpop.f32.mrf.mxu3 }
 0x39b   :  { %442 = vmatmul.f32.vlgmr.msrb.gmra.mxu0 %v378_v35 }
 0x39c   :  { %1388 = vmatpush.msrb.mxu0 %v1372_v23 }
 0x39f   :  { %1504 = vmatmul.msk.f32.gmra.mxu3 %vm508_vm0, %v708_v28  ;;  %v711_v31 = vpop.f32.mrf.mxu2 }
 0x3a0   :  { %1555 = vmatmul.msk.f32.gmra.mxu2 %vm508_vm0, %v2019_v24 }
 0x3a2   :  { %v381_v38 = vpop.f32.mrf.mxu3 }
 0x3a3   :  { %445 = vmatmul.f32.gmra.mxu0 %v381_v38 }
 0x3a7   :  { %1505 = vmatmul.msk.f32.gmra.mxu3 %vm508_vm0, %v711_v31  ;;  %v714_v33 = vpop.f32.mrf.mxu2 }
 0x3a8   :  { %1556 = vmatmul.msk.f32.gmra.mxu2 %vm508_vm0, %v2013_v21 }
 0x3aa   :  { %v384_v41 = vpop.f32.mrf.mxu3 }
 0x3ab   :  { %448 = vmatmul.f32.gmra.mxu0 %v384_v41 }
 0x3af   :  { %1506 = vmatmul.msk.f32.gmra.mxu3 %vm508_vm0, %v714_v33  ;;  %v717_v35 = vpop.f32.mrf.mxu2 }
 0x3b0   :  { %1557 = vmatmul.msk.f32.gmra.mxu2 %vm508_vm0, %v2002_v19 }
 0x3b2   :  { %v387_v44 = vpop.f32.mrf.mxu3 }
 0x3b3   :  { %451 = vmatmul.f32.gmra.mxu0 %v387_v44 }
 0x3b7   :  { %1507 = vmatmul.msk.f32.gmra.mxu3 %vm508_vm0, %v717_v35  ;;  %v720_v38 = vpop.f32.mrf.mxu2 }
 0x3b8   :  { %1558 = vmatmul.msk.f32.gmra.mxu2 %vm508_vm0, %v1996_v18 }
 0x3ba   :  { %v390_v47 = vpop.f32.mrf.mxu3 }
 0x3bb   :  { %454 = vmatmul.f32.gmra.mxu0 %v390_v47 }
 0x3bf   :  { %1508 = vmatmul.msk.f32.gmra.mxu3 %vm508_vm0, %v720_v38  ;;  %v723_v41 = vpop.f32.mrf.mxu2 }
 0x3c0   :  { %1559 = vmatmul.msk.f32.gmra.mxu2 %vm508_vm0, %v1990_v16 }
 0x3c2   :  { %v393_v50 = vpop.f32.mrf.mxu3 }
 0x3c3   :  { %457 = vmatmul.f32.gmra.mxu0 %v393_v50  ;;  %v595_v50 = vpop.f32.mrf.mxu1 }
 0x3c7   :  { %1509 = vmatmul.msk.f32.gmra.mxu3 %vm508_vm0, %v723_v41  ;;  %v726_v44 = vpop.f32.mrf.mxu2 }
 0x3c8   :  { %1560 = vmatmul.msk.f32.gmra.mxu2 %vm508_vm0, %v1985_v15 }
 0x3ca   :  { %v396_v53 = vpop.f32.mrf.mxu3 }
 0x3cb   :  { %460 = vmatmul.f32.gmra.mxu0 %v396_v53  ;;  %v598_v53 = vpop.f32.mrf.mxu1 }
 0x3cf   :  { %1510 = vmatmul.msk.f32.gmra.mxu3 %vm508_vm0, %v726_v44  ;;  %v729_v47 = vpop.f32.mrf.mxu2 }
 0x3d0   :  { %1561 = vmatmul.msk.f32.gmra.mxu2 %vm508_vm0, %v1978_v14 }
 0x3d2   :  { %v399_v56 = vpop.f32.mrf.mxu3 }
 0x3d3   :  { %463 = vmatmul.f32.gmra.mxu0 %v399_v56  ;;  %v601_v57 = vpop.f32.mrf.mxu1 }
 0x3d7   :  { %1511 = vmatmul.msk.f32.gmra.mxu3 %vm508_vm0, %v729_v47  ;;  %v732_v49 = vpop.f32.mrf.mxu2 }
 0x3d8   :  { %1562 = vmatmul.msk.f32.gmra.mxu2 %vm508_vm0, %v1972_v13 }
 0x3da   :  { %v402_v59 = vpop.f32.mrf.mxu3 }
 0x3db   :  { %466 = vmatmul.f32.gmra.mxu0 %v402_v59  ;;  %v604_v60 = vpop.f32.mrf.mxu1 }
 0x3df   :  { %1512 = vmatmul.msk.f32.gmra.mxu3 %vm508_vm0, %v732_v49  ;;  %v735_v52 = vpop.f32.mrf.mxu2 }
 0x3e0   :  { %1563 = vmatmul.msk.f32.gmra.mxu2 %vm508_vm0, %v1966_v12 }
 0x3e2   :  { %v405_v62 = vpop.f32.mrf.mxu3 }
 0x3e3   :  { %469 = vmatmul.f32.gmra.mxu0 %v405_v62  ;;  %v607_v0 = vpop.f32.mrf.mxu1 }
 0x3e7   :  { %1513 = vmatmul.msk.f32.gmra.mxu3 %vm508_vm0, %v735_v52  ;;  %v738_v55 = vpop.f32.mrf.mxu2 }
 0x3e8   :  { %1564 = vmatmul.msk.f32.gmra.mxu2 %vm508_vm0, %v1961_v11 }
 0x3ea   :  { %v408_v1 = vpop.f32.mrf.mxu3 }
 0x3eb   :  { %472 = vmatmul.f32.gmra.mxu0 %v408_v1 }
 0x3ef   :  { %1514 = vmatmul.msk.f32.gmra.mxu3 %vm508_vm0, %v738_v55  ;;  %v741_v58 = vpop.f32.mrf.mxu2 }
 0x3f0   :  { %1565 = vmatmul.msk.f32.gmra.mxu2 %vm508_vm0, %v1954_v10 }
 0x3f2   :  { %v411_v6 = vpop.f32.mrf.mxu3 }
 0x3f3   :  { %475 = vmatmul.f32.gmra.mxu0 %v411_v6  ;;  %v610_v6 = vpop.f32.mrf.mxu1 }
 0x3f7   :  { %1515 = vmatmul.msk.f32.gmra.mxu3 %vm508_vm0, %v741_v58  ;;  %v744_v61 = vpop.f32.mrf.mxu2 }
 0x3f8   :  { %1566 = vmatmul.msk.f32.gmra.mxu2 %vm508_vm0, %v1949_v9 }
 0x3fa   :  { %v414_v25 = vpop.f32.mrf.mxu3 }
 0x3fb   :  { %478 = vmatmul.f32.gmra.mxu0 %v414_v25 }
 0x3ff   :  { %1516 = vmatmul.msk.f32.gmra.mxu3 %vm508_vm0, %v744_v61  ;;  %v747_v63 = vpop.f32.mrf.mxu2 }
 0x402   :  { %v417_v30 = vpop.f32.mrf.mxu3 }
 0x403   :  { %481 = vmatmul.f32.gmra.mxu0 %v417_v30 }
 0x407   :  { %1517 = vmatmul.msk.f32.gmra.mxu3 %vm508_vm0, %v747_v63  ;;  %v750_v3 = vpop.f32.mrf.mxu2 }
 0x40a   :  { %v420_v22 = vpop.f32.mrf.mxu3 }
 0x40b   :  { %484 = vmatmul.f32.gmra.mxu0 %v420_v22 }
 0x40f   :  { %1518 = vmatmul.msk.f32.gmra.mxu3 %vm508_vm0, %v750_v3 }
 0x412   :  { %v423_v34 = vpop.f32.mrf.mxu3 }
 0x413   :  { %487 = vmatmul.f32.gmra.mxu0 %v423_v34 }
 0x417   :  { %1567 = vmatmul.msk.f32.vlgmr.msrb.gmra.mxu3 %vm508_vm0, %v2056_v27 }
 0x418   :  { %v443_v37 = vpop.f32.mrf.mxu0 }
 0x419   :  { %1535 = vmatmul.msk.f32.vlgmr.msrb.gmra.mxu1 %vm508_vm0, %v443_v37 }
 0x41a   :  { %v819_v8 = vpop.f32.mrf.mxu3 }
 0x41b   :  { %1519 = vmatmul.msk.f32.vlgmr.msra.gmra.mxu0 %vm508_vm0, %v574_v4  ;;  %v613_v4 = vpop.f32.mrf.mxu1 }
 0x41f   :  { %1568 = vmatmul.msk.f32.gmra.mxu3 %vm508_vm0, %v2047_v26 }
 0x420   :  { %v446_v40 = vpop.f32.mrf.mxu0 }
 0x421   :  { %1536 = vmatmul.msk.f32.gmra.mxu1 %vm508_vm0, %v446_v40 }
 0x422   :  { %v822_v5 = vpop.f32.mrf.mxu3 }
 0x423   :  { %1520 = vmatmul.msk.f32.gmra.mxu0 %vm508_vm0, %v577_v29  ;;  %v616_v28 = vpop.f32.mrf.mxu1 }
 0x427   :  { %1569 = vmatmul.msk.f32.gmra.mxu3 %vm508_vm0, %v2038_v17 }
 0x428   :  { %v449_v42 = vpop.f32.mrf.mxu0 }
 0x429   :  { %1537 = vmatmul.msk.f32.gmra.mxu1 %vm508_vm0, %v449_v42 }
 0x42a   :  { %v825_v23 = vpop.f32.mrf.mxu3 }
 0x42b   :  { %1521 = vmatmul.msk.f32.gmra.mxu0 %vm508_vm0, %v580_v32  ;;  %v619_v30 = vpop.f32.mrf.mxu1 }
 0x42f   :  { %1570 = vmatmul.msk.f32.gmra.mxu3 %vm508_vm0, %v2028_v2 }
 0x430   :  { %v452_v45 = vpop.f32.mrf.mxu0 }
 0x431   :  { %1538 = vmatmul.msk.f32.gmra.mxu1 %vm508_vm0, %v452_v45 }
 0x432   :  { %v828_v31 = vpop.f32.mrf.mxu3 }
 0x433   :  { %1522 = vmatmul.msk.f32.gmra.mxu0 %vm508_vm0, %v583_v36 }
 0x437   :  { %1571 = vmatmul.msk.f32.gmra.mxu3 %vm508_vm0, %v2019_v24 }
 0x438   :  { %v455_v48 = vpop.f32.mrf.mxu0 }
 0x439   :  { %1539 = vmatmul.msk.f32.gmra.mxu1 %vm508_vm0, %v455_v48 }
 0x43a   :  { %v831_v33 = vpop.f32.mrf.mxu3 }
 0x43b   :  { %1523 = vmatmul.msk.f32.gmra.mxu0 %vm508_vm0, %v586_v39 }
 0x43f   :  { %1572 = vmatmul.msk.f32.gmra.mxu3 %vm508_vm0, %v2013_v21 }
 0x440   :  { %v458_v51 = vpop.f32.mrf.mxu0 }
 0x441   :  { %1540 = vmatmul.msk.f32.gmra.mxu1 %vm508_vm0, %v458_v51 }
 0x442   :  { %v834_v38 = vpop.f32.mrf.mxu3 }
 0x443   :  { %1524 = vmatmul.msk.f32.gmra.mxu0 %vm508_vm0, %v589_v43 }
 0x447   :  { %1573 = vmatmul.msk.f32.gmra.mxu3 %vm508_vm0, %v2002_v19 }
 0x448   :  { %v461_v54 = vpop.f32.mrf.mxu0 }
 0x449   :  { %1541 = vmatmul.msk.f32.gmra.mxu1 %vm508_vm0, %v461_v54 }
 0x44a   :  { %v837_v42 = vpop.f32.mrf.mxu3 }
 0x44b   :  { %1525 = vmatmul.msk.f32.gmra.mxu0 %vm508_vm0, %v592_v46 }
 0x44f   :  { %1574 = vmatmul.msk.f32.gmra.mxu3 %vm508_vm0, %v1996_v18 }
 0x450   :  { %v464_v56 = vpop.f32.mrf.mxu0 }
 0x451   :  { %1542 = vmatmul.msk.f32.gmra.mxu1 %vm508_vm0, %v464_v56 }
 0x452   :  { %v840_v46 = vpop.f32.mrf.mxu3 }
 0x453   :  { %1526 = vmatmul.msk.f32.gmra.mxu0 %vm508_vm0, %v595_v50 }
 0x457   :  { %1575 = vmatmul.msk.f32.gmra.mxu3 %vm508_vm0, %v1990_v16 }
 0x458   :  { %v467_v59 = vpop.f32.mrf.mxu0 }
 0x459   :  { %1543 = vmatmul.msk.f32.gmra.mxu1 %vm508_vm0, %v467_v59 }
 0x45a   :  { %v843_v50 = vpop.f32.mrf.mxu3 }
 0x45b   :  { %1527 = vmatmul.msk.f32.gmra.mxu0 %vm508_vm0, %v598_v53 }
 0x45f   :  { %1576 = vmatmul.msk.f32.gmra.mxu3 %vm508_vm0, %v1985_v15 }
 0x460   :  { %v470_v62 = vpop.f32.mrf.mxu0 }
 0x461   :  { %1544 = vmatmul.msk.f32.gmra.mxu1 %vm508_vm0, %v470_v62 }
 0x462   :  { %v846_v54 = vpop.f32.mrf.mxu3 }
 0x463   :  { %1528 = vmatmul.msk.f32.gmra.mxu0 %vm508_vm0, %v601_v57 }
 0x467   :  { %1577 = vmatmul.msk.f32.gmra.mxu3 %vm508_vm0, %v1978_v14 }
 0x468   :  { %v473_v1 = vpop.f32.mrf.mxu0 }
 0x469   :  { %1545 = vmatmul.msk.f32.gmra.mxu1 %vm508_vm0, %v473_v1 }
 0x46a   :  { %v849_v58 = vpop.f32.mrf.mxu3 }
 0x46b   :  { %1529 = vmatmul.msk.f32.gmra.mxu0 %vm508_vm0, %v604_v60 }
 0x46f   :  { %1578 = vmatmul.msk.f32.gmra.mxu3 %vm508_vm0, %v1972_v13 }
 0x470   :  { %v476_v7 = vpop.f32.mrf.mxu0 }
 0x471   :  { %1546 = vmatmul.msk.f32.gmra.mxu1 %vm508_vm0, %v476_v7 }
 0x472   :  { %v852_v62 = vpop.f32.mrf.mxu3 }
 0x473   :  { %1530 = vmatmul.msk.f32.gmra.mxu0 %vm508_vm0, %v607_v0 }
 0x477   :  { %1579 = vmatmul.msk.f32.gmra.mxu3 %vm508_vm0, %v1966_v12 }
 0x478   :  { %v479_v20 = vpop.f32.mrf.mxu0 }
 0x479   :  { %1547 = vmatmul.msk.f32.gmra.mxu1 %vm508_vm0, %v479_v20 }
 0x47a   :  { %v855_v3 = vpop.f32.mrf.mxu3 }
 0x47b   :  { %1531 = vmatmul.msk.f32.gmra.mxu0 %vm508_vm0, %v610_v6 }
 0x47f   :  { %1580 = vmatmul.msk.f32.gmra.mxu3 %vm508_vm0, %v1961_v11 }
 0x480   :  { %v482_v25 = vpop.f32.mrf.mxu0 }
 0x481   :  { %1548 = vmatmul.msk.f32.gmra.mxu1 %vm508_vm0, %v482_v25 }
 0x482   :  { %v858_v20 = vpop.f32.mrf.mxu3 }
 0x483   :  { %1532 = vmatmul.msk.f32.gmra.mxu0 %vm508_vm0, %v613_v4 }
 0x487   :  { %1581 = vmatmul.msk.f32.gmra.mxu3 %vm508_vm0, %v1954_v10 }
 0x488   :  { %v485_v29 = vpop.f32.mrf.mxu0 }
 0x489   :  { %1549 = vmatmul.msk.f32.gmra.mxu1 %vm508_vm0, %v485_v29 }
 0x48b   :  { %1533 = vmatmul.msk.f32.gmra.mxu0 %vm508_vm0, %v616_v28  ;;  %v861_v28 = vpop.f32.mrf.mxu3 }
 0x48f   :  { %1582 = vmatmul.msk.f32.gmra.mxu3 %vm508_vm0, %v1949_v9 }
 0x490   :  { %v488_v32 = vpop.f32.mrf.mxu0 }
 0x491   :  { %1550 = vmatmul.msk.f32.gmra.mxu1 %vm508_vm0, %v488_v32 }
 0x493   :  { %1534 = vmatmul.msk.f32.gmra.mxu0 %vm508_vm0, %v619_v30 }
 0x496   :  { %v1046_v22 = vpop.f32.mrf.mxu1 }
 0x498   :  { %v932_v34 = vpop.f32.mrf.mxu0 }
 0x499   :  { %v933_v35 = vadd.f32 %v932_v34, %v819_v8 }
 0x49b   :  { %v1094_v36 = vadd.f32 %v1046_v22, %v933_v35  ;;  %1583 = vmatmul.msk.f32.vlgmr.msrb.gmra.mxu0 %vm508_vm0, %v2056_v27 }
 0x49d   :  { %1111 = vst.msk [vmem:[%s2606_s13] sm:$0xff] %vm1110_vm1, %v1094_v36 }
 0x49e   :  { %v1049_v37 = vpop.f32.mrf.mxu1 }
 0x4a0   :  { %v935_v39 = vpop.f32.mrf.mxu0 }
 0x4a1   :  { %v936_v40 = vadd.f32 %v935_v39, %v822_v5 }
 0x4a3   :  { %v1095_v41 = vadd.f32 %v1049_v37, %v936_v40  ;;  %1584 = vmatmul.msk.f32.gmra.mxu0 %vm508_vm0, %v2047_v26 }
 0x4a5   :  { %1112 = vst.msk [vmem:[%s2606_s13 + $0x8] sm:$0xff] %vm1110_vm1, %v1095_v41 }
 0x4a6   :  { %v1052_v27 = vpop.f32.mrf.mxu1 }
 0x4a8   :  { %v938_v43 = vpop.f32.mrf.mxu0 }
 0x4a9   :  { %v939_v44 = vadd.f32 %v938_v43, %v825_v23 }
 0x4ab   :  { %v1096_v45 = vadd.f32 %v1052_v27, %v939_v44  ;;  %1585 = vmatmul.msk.f32.gmra.mxu0 %vm508_vm0, %v2038_v17 }
 0x4ad   :  { %1113 = vst.msk [vmem:[%s2606_s13 + $0x10] sm:$0xff] %vm1110_vm1, %v1096_v45 }
 0x4ae   :  { %v1055_v26 = vpop.f32.mrf.mxu1 }
 0x4b0   :  { %v941_v47 = vpop.f32.mrf.mxu0 }
 0x4b1   :  { %v942_v48 = vadd.f32 %v941_v47, %v828_v31  ;;  %v864_v31 = vpop.f32.mrf.mxu3 }
 0x4b3   :  { %v1097_v49 = vadd.f32 %v1055_v26, %v942_v48  ;;  %1586 = vmatmul.msk.f32.gmra.mxu0 %vm508_vm0, %v2028_v2 }
 0x4b5   :  { %1114 = vst.msk [vmem:[%s2606_s13 + $0x18] sm:$0xff] %vm1110_vm1, %v1097_v49 }
 0x4b6   :  { %v1058_v17 = vpop.f32.mrf.mxu1 }
 0x4b8   :  { %v944_v51 = vpop.f32.mrf.mxu0 }
 0x4b9   :  { %v945_v52 = vadd.f32 %v944_v51, %v831_v33  ;;  %v1292_v36 = vpop.f32.mrf.mxu3 }
 0x4ba   :  { %v1340_v37 = vpack.c.bf16 %v1292_v36, %v1292_v36 }
 0x4bb   :  { %v1098_v53 = vadd.f32 %v1058_v17, %v945_v52  ;;  %1587 = vmatmul.msk.f32.gmra.mxu0 %vm508_vm0, %v2019_v24 }
 0x4bc   :  { %1356 = vst.msk [vmem:[%s2608_s15] sm:$0xf] %vm1257_vm2, %v1340_v37 }
 0x4bd   :  { %1115 = vst.msk [vmem:[%s2606_s13 + $0x20] sm:$0xff] %vm1110_vm1, %v1098_v53 }
 0x4be   :  { %v1061_v2 = vpop.f32.mrf.mxu1 }
 0x4c0   :  { %v947_v55 = vpop.f32.mrf.mxu0 }
 0x4c1   :  { %v948_v56 = vadd.f32 %v947_v55, %v834_v38 }
 0x4c3   :  { %v1099_v57 = vadd.f32 %v1061_v2, %v948_v56  ;;  %1588 = vmatmul.msk.f32.gmra.mxu0 %vm508_vm0, %v2013_v21 }
 0x4c5   :  { %1116 = vst.msk [vmem:[%s2606_s13 + $0x28] sm:$0xff] %vm1110_vm1, %v1099_v57 }
 0x4c6   :  { %v1064_v24 = vpop.f32.mrf.mxu1 }
 0x4c8   :  { %v950_v59 = vpop.f32.mrf.mxu0 }
 0x4c9   :  { %v951_v60 = vadd.f32 %v950_v59, %v837_v42  ;;  %v1295_v42 = vpop.f32.mrf.mxu3 }
 0x4ca   :  { %v1341_v43 = vpack.c.bf16 %v1295_v42, %v1295_v42 }
 0x4cb   :  { %v1100_v61 = vadd.f32 %v1064_v24, %v951_v60  ;;  %1589 = vmatmul.msk.f32.gmra.mxu0 %vm508_vm0, %v2002_v19 }
 0x4cc   :  { %1357 = vst.msk [vmem:[%s2608_s15 + $0x4] sm:$0xf] %vm1257_vm2, %v1341_v43 }
 0x4cd   :  { %1117 = vst.msk [vmem:[%s2606_s13 + $0x30] sm:$0xff] %vm1110_vm1, %v1100_v61 }
 0x4ce   :  { %v1067_v21 = vpop.f32.mrf.mxu1 }
 0x4d0   :  { %v953_v63 = vpop.f32.mrf.mxu0 }
 0x4d1   :  { %v954_v0 = vadd.f32 %v953_v63, %v840_v46  ;;  %v1298_v47 = vpop.f32.mrf.mxu3 }
 0x4d2   :  { %v1342_v48 = vpack.c.bf16 %v1298_v47, %v1298_v47 }
 0x4d3   :  { %v1101_v1 = vadd.f32 %v1067_v21, %v954_v0  ;;  %1590 = vmatmul.msk.f32.gmra.mxu0 %vm508_vm0, %v1996_v18 }
 0x4d4   :  { %1358 = vst.msk [vmem:[%s2608_s15 + $0x8] sm:$0xf] %vm1257_vm2, %v1342_v48 }
 0x4d5   :  { %1118 = vst.msk [vmem:[%s2606_s13 + $0x38] sm:$0xff] %vm1110_vm1, %v1101_v1 }
 0x4d6   :  { %v1070_v19 = vpop.f32.mrf.mxu1 }
 0x4d8   :  { %v956_v6 = vpop.f32.mrf.mxu0 }
 0x4d9   :  { %v957_v7 = vadd.f32 %v956_v6, %v843_v50  ;;  %v1301_v53 = vpop.f32.mrf.mxu3 }
 0x4da   :  { %v1343_v2 = vpack.c.bf16 %v1301_v53, %v1301_v53 }
 0x4db   :  { %v1102_v8 = vadd.f32 %v1070_v19, %v957_v7  ;;  %1591 = vmatmul.msk.f32.gmra.mxu0 %vm508_vm0, %v1990_v16 }
 0x4dc   :  { %1359 = vst.msk [vmem:[%s2608_s15 + $0xc] sm:$0xf] %vm1257_vm2, %v1343_v2 }
 0x4dd   :  { %1119 = vst.msk [vmem:[%s2606_s13 + $0x40] sm:$0xff] %vm1110_vm1, %v1102_v8 }
 0x4de   :  { %v1073_v18 = vpop.f32.mrf.mxu1 }
 0x4e0   :  { %v959_v4 = vpop.f32.mrf.mxu0 }
 0x4e1   :  { %v960_v5 = vadd.f32 %v959_v4, %v846_v54 }
 0x4e3   :  { %v1103_v25 = vadd.f32 %v1073_v18, %v960_v5  ;;  %1592 = vmatmul.msk.f32.gmra.mxu0 %vm508_vm0, %v1985_v15 }
 0x4e5   :  { %1120 = vst.msk [vmem:[%s2606_s13 + $0x48] sm:$0xff] %vm1110_vm1, %v1103_v25 }
 0x4e6   :  { %v1076_v16 = vpop.f32.mrf.mxu1 }
 0x4e8   :  { %v962_v23 = vpop.f32.mrf.mxu0 }
 0x4e9   :  { %v963_v29 = vadd.f32 %v962_v23, %v849_v58  ;;  %v1304_v58 = vpop.f32.mrf.mxu3 }
 0x4ea   :  { %v1344_v59 = vpack.c.bf16 %v1304_v58, %v1304_v58 }
 0x4eb   :  { %v1104_v30 = vadd.f32 %v1076_v16, %v963_v29  ;;  %1593 = vmatmul.msk.f32.gmra.mxu0 %vm508_vm0, %v1978_v14  ;;  %v1193_v14 = vpop.f32.mrf.mxu2 }
 0x4ec   :  { %v1241_v35 = vpack.c.bf16 %v1193_v14, %v1193_v14  ;;  %1360 = vst.msk [vmem:[%s2608_s15 + $0x10] sm:$0xf] %vm1257_vm2, %v1344_v59 }
 0x4ed   :  { %1121 = vst.msk [vmem:[%s2606_s13 + $0x50] sm:$0xff] %vm1110_vm1, %v1104_v30 }
 0x4ee   :  { %v1079_v15 = vpop.f32.mrf.mxu1  ;;  %1258 = vst.msk [vmem:[%s2607_s14] sm:$0xf] %vm1257_vm2, %v1241_v35 }
 0x4f0   :  { %v965_v32 = vpop.f32.mrf.mxu0 }
 0x4f1   :  { %v966_v22 = vadd.f32 %v965_v32, %v852_v62  ;;  %v1307_v21 = vpop.f32.mrf.mxu3 }
 0x4f2   :  { %v1345_v62 = vpack.c.bf16 %v1307_v21, %v1307_v21 }
 0x4f3   :  { %v1105_v33 = vadd.f32 %v1079_v15, %v966_v22  ;;  %1594 = vmatmul.msk.f32.gmra.mxu0 %vm508_vm0, %v1972_v13  ;;  %v1196_v40 = vpop.f32.mrf.mxu2 }
 0x4f4   :  { %v1242_v27 = vpack.c.bf16 %v1196_v40, %v1196_v40  ;;  %1361 = vst.msk [vmem:[%s2608_s15 + $0x14] sm:$0xf] %vm1257_vm2, %v1345_v62 }
 0x4f5   :  { %1122 = vst.msk [vmem:[%s2606_s13 + $0x58] sm:$0xff] %vm1110_vm1, %v1105_v33 }
 0x4f6   :  { %v1082_v34 = vpop.f32.mrf.mxu1  ;;  %1259 = vst.msk [vmem:[%s2607_s14 + $0x4] sm:$0xf] %vm1257_vm2, %v1242_v27 }
 0x4f8   :  { %v968_v38 = vpop.f32.mrf.mxu0 }
 0x4f9   :  { %v969_v39 = vadd.f32 %v968_v38, %v855_v3  ;;  %v1310_v19 = vpop.f32.mrf.mxu3 }
 0x4fa   :  { %v1346_v3 = vpack.c.bf16 %v1310_v19, %v1310_v19 }
 0x4fb   :  { %v1106_v13 = vadd.f32 %v1082_v34, %v969_v39  ;;  %1595 = vmatmul.msk.f32.gmra.mxu0 %vm508_vm0, %v1966_v12  ;;  %v1199_v26 = vpop.f32.mrf.mxu2 }
 0x4fc   :  { %v1243_v46 = vpack.c.bf16 %v1199_v26, %v1199_v26  ;;  %1362 = vst.msk [vmem:[%s2608_s15 + $0x18] sm:$0xf] %vm1257_vm2, %v1346_v3 }
 0x4fd   :  { %1123 = vst.msk [vmem:[%s2606_s13 + $0x60] sm:$0xff] %vm1110_vm1, %v1106_v13 }
 0x4fe   :  { %v1085_v41 = vpop.f32.mrf.mxu1  ;;  %1260 = vst.msk [vmem:[%s2607_s14 + $0x8] sm:$0xf] %vm1257_vm2, %v1243_v46 }
 0x500   :  { %v971_v44 = vpop.f32.mrf.mxu0 }
 0x501   :  { %v972_v45 = vadd.f32 %v971_v44, %v858_v20  ;;  %v1313_v18 = vpop.f32.mrf.mxu3 }
 0x502   :  { %v1347_v20 = vpack.c.bf16 %v1313_v18, %v1313_v18 }
 0x503   :  { %v1107_v12 = vadd.f32 %v1085_v41, %v972_v45  ;;  %1596 = vmatmul.msk.f32.gmra.mxu0 %vm508_vm0, %v1961_v11  ;;  %v1202_v51 = vpop.f32.mrf.mxu2 }
 0x504   :  { %v1244_v52 = vpack.c.bf16 %v1202_v51, %v1202_v51  ;;  %1363 = vst.msk [vmem:[%s2608_s15 + $0x1c] sm:$0xf] %vm1257_vm2, %v1347_v20 }
 0x505   :  { %1124 = vst.msk [vmem:[%s2606_s13 + $0x68] sm:$0xff] %vm1110_vm1, %v1107_v12 }
 0x506   :  { %v1088_v49 = vpop.f32.mrf.mxu1  ;;  %1261 = vst.msk [vmem:[%s2607_s14 + $0xc] sm:$0xf] %vm1257_vm2, %v1244_v52 }
 0x508   :  { %v974_v17 = vpop.f32.mrf.mxu0 }
 0x509   :  { %v975_v50 = vadd.f32 %v974_v17, %v861_v28  ;;  %v1316_v16 = vpop.f32.mrf.mxu3 }
 0x50a   :  { %v1348_v28 = vpack.c.bf16 %v1316_v16, %v1316_v16 }
 0x50b   :  { %v1108_v11 = vadd.f32 %v1088_v49, %v975_v50  ;;  %1597 = vmatmul.msk.f32.gmra.mxu0 %vm508_vm0, %v1954_v10  ;;  %v1205_v57 = vpop.f32.mrf.mxu2 }
 0x50c   :  { %v1245_v24 = vpack.c.bf16 %v1205_v57, %v1205_v57  ;;  %1364 = vst.msk [vmem:[%s2608_s15 + $0x20] sm:$0xf] %vm1257_vm2, %v1348_v28 }
 0x50d   :  { %1125 = vst.msk [vmem:[%s2606_s13 + $0x70] sm:$0xff] %vm1110_vm1, %v1108_v11 }
 0x50e   :  { %v1091_v10 = vpop.f32.mrf.mxu1  ;;  %1262 = vst.msk [vmem:[%s2607_s14 + $0x10] sm:$0xf] %vm1257_vm2, %v1245_v24 }
 0x510   :  { %v977_v54 = vpop.f32.mrf.mxu0 }
 0x511   :  { %v978_v55 = vadd.f32 %v977_v54, %v864_v31  ;;  %v1319_v15 = vpop.f32.mrf.mxu3 }
 0x512   :  { %v1349_v31 = vpack.c.bf16 %v1319_v15, %v1319_v15 }
 0x513   :  { %v1109_v56 = vadd.f32 %v1091_v10, %v978_v55  ;;  %1598 = vmatmul.msk.f32.gmra.mxu0 %vm508_vm0, %v1949_v9  ;;  %v1208_v9 = vpop.f32.mrf.mxu2 }
 0x514   :  { %v1246_v61 = vpack.c.bf16 %v1208_v9, %v1208_v9  ;;  %1365 = vst.msk [vmem:[%s2608_s15 + $0x24] sm:$0xf] %vm1257_vm2, %v1349_v31 }
 0x515   :  { %1126 = vst.msk [vmem:[%s2606_s13 + $0x78] sm:$0xff] %vm1110_vm1, %v1109_v56 }
 0x516   :  { %1263 = vst.msk [vmem:[%s2607_s14 + $0x14] sm:$0xf] %vm1257_vm2, %v1246_v61 }
 0x518   :  { %v1390_v60 = vpop.f32.mrf.mxu0 }
 0x519   :  { %1439 = vst.msk [vmem:[%s2609_s16] sm:$0xff] %vm1438_vm3, %v1390_v60  ;;  %v1322_v14 = vpop.f32.mrf.mxu3 }
 0x51a   :  { %v1350_v34 = vpack.c.bf16 %v1322_v14, %v1322_v14 }
 0x51b   :  { %v1211_v0 = vpop.f32.mrf.mxu2 }
 0x51c   :  { %v1247_v1 = vpack.c.bf16 %v1211_v0, %v1211_v0  ;;  %1366 = vst.msk [vmem:[%s2608_s15 + $0x28] sm:$0xf] %vm1257_vm2, %v1350_v34 }
 0x51e   :  { %1264 = vst.msk [vmem:[%s2607_s14 + $0x18] sm:$0xf] %vm1257_vm2, %v1247_v1 }
 0x520   :  { %v1393_v63 = vpop.f32.mrf.mxu0 }
 0x521   :  { %1440 = vst.msk [vmem:[%s2609_s16 + $0x8] sm:$0xff] %vm1438_vm3, %v1393_v63  ;;  %v1325_v38 = vpop.f32.mrf.mxu3 }
 0x522   :  { %v1351_v39 = vpack.c.bf16 %v1325_v38, %v1325_v38 }
 0x523   :  { %v1214_v7 = vpop.f32.mrf.mxu2 }
 0x524   :  { %v1248_v8 = vpack.c.bf16 %v1214_v7, %v1214_v7  ;;  %1367 = vst.msk [vmem:[%s2608_s15 + $0x2c] sm:$0xf] %vm1257_vm2, %v1351_v39 }
 0x526   :  { %1265 = vst.msk [vmem:[%s2607_s14 + $0x1c] sm:$0xf] %vm1257_vm2, %v1248_v8 }
 0x528   :  { %v1396_v6 = vpop.f32.mrf.mxu0 }
 0x529   :  { %1441 = vst.msk [vmem:[%s2609_s16 + $0x10] sm:$0xff] %vm1438_vm3, %v1396_v6  ;;  %v1328_v27 = vpop.f32.mrf.mxu3 }
 0x52a   :  { %v1352_v42 = vpack.c.bf16 %v1328_v27, %v1328_v27 }
 0x52b   :  { %v1217_v5 = vpop.f32.mrf.mxu2 }
 0x52c   :  { %v1249_v25 = vpack.c.bf16 %v1217_v5, %v1217_v5  ;;  %1368 = vst.msk [vmem:[%s2608_s15 + $0x30] sm:$0xf] %vm1257_vm2, %v1352_v42 }
 0x52e   :  { %1266 = vst.msk [vmem:[%s2607_s14 + $0x20] sm:$0xf] %vm1257_vm2, %v1249_v25 }
 0x530   :  { %v1399_v4 = vpop.f32.mrf.mxu0 }
 0x531   :  { %1442 = vst.msk [vmem:[%s2609_s16 + $0x18] sm:$0xff] %vm1438_vm3, %v1399_v4  ;;  %v1331_v12 = vpop.f32.mrf.mxu3 }
 0x532   :  { %v1353_v26 = vpack.c.bf16 %v1331_v12, %v1331_v12 }
 0x533   :  { %v1220_v29 = vpop.f32.mrf.mxu2 }
 0x534   :  { %v1250_v30 = vpack.c.bf16 %v1220_v29, %v1220_v29  ;;  %1369 = vst.msk [vmem:[%s2608_s15 + $0x34] sm:$0xf] %vm1257_vm2, %v1353_v26 }
 0x536   :  { %1267 = vst.msk [vmem:[%s2607_s14 + $0x24] sm:$0xf] %vm1257_vm2, %v1250_v30 }
 0x538   :  { %v1402_v23 = vpop.f32.mrf.mxu0 }
 0x539   :  { %1443 = vst.msk [vmem:[%s2609_s16 + $0x20] sm:$0xff] %vm1438_vm3, %v1402_v23  ;;  %v1334_v49 = vpop.f32.mrf.mxu3 }
 0x53a   :  { %v1354_v17 = vpack.c.bf16 %v1334_v49, %v1334_v49 }
 0x53b   :  { %v1223_v22 = vpop.f32.mrf.mxu2 }
 0x53c   :  { %v1251_v33 = vpack.c.bf16 %v1223_v22, %v1223_v22  ;;  %1370 = vst.msk [vmem:[%s2608_s15 + $0x38] sm:$0xf] %vm1257_vm2, %v1354_v17 }
 0x53e   :  { %1268 = vst.msk [vmem:[%s2607_s14 + $0x28] sm:$0xf] %vm1257_vm2, %v1251_v33 }
 0x540   :  { %v1405_v32 = vpop.f32.mrf.mxu0 }
 0x541   :  { %1444 = vst.msk [vmem:[%s2609_s16 + $0x28] sm:$0xff] %vm1438_vm3, %v1405_v32  ;;  %v1337_v52 = vpop.f32.mrf.mxu3 }
 0x542   :  { %v1355_v53 = vpack.c.bf16 %v1337_v52, %v1337_v52 }
 0x543   :  { %v1226_v36 = vpop.f32.mrf.mxu2 }
 0x544   :  { %v1252_v37 = vpack.c.bf16 %v1226_v36, %v1226_v36  ;;  %1371 = vst.msk [vmem:[%s2608_s15 + $0x3c] sm:$0xf] %vm1257_vm2, %v1355_v53 }
 0x546   :  { %1269 = vst.msk [vmem:[%s2607_s14 + $0x2c] sm:$0xf] %vm1257_vm2, %v1252_v37 }
 0x548   :  { %v1408_v35 = vpop.f32.mrf.mxu0 }
 0x549   :  { %1445 = vst.msk [vmem:[%s2609_s16 + $0x30] sm:$0xff] %vm1438_vm3, %v1408_v35 }
 0x54b   :  { %v1229_v40 = vpop.f32.mrf.mxu2 }
 0x54c   :  { %v1253_v41 = vpack.c.bf16 %v1229_v40, %v1229_v40 }
 0x54e   :  { %1270 = vst.msk [vmem:[%s2607_s14 + $0x30] sm:$0xf] %vm1257_vm2, %v1253_v41 }
 0x550   :  { %v1411_v13 = vpop.f32.mrf.mxu0 }
 0x551   :  { %1446 = vst.msk [vmem:[%s2609_s16 + $0x38] sm:$0xff] %vm1438_vm3, %v1411_v13 }
 0x553   :  { %v1232_v44 = vpop.f32.mrf.mxu2 }
 0x554   :  { %v1254_v45 = vpack.c.bf16 %v1232_v44, %v1232_v44 }
 0x556   :  { %1271 = vst.msk [vmem:[%s2607_s14 + $0x34] sm:$0xf] %vm1257_vm2, %v1254_v45 }
 0x558   :  { %v1414_v43 = vpop.f32.mrf.mxu0 }
 0x559   :  { %1447 = vst.msk [vmem:[%s2609_s16 + $0x40] sm:$0xff] %vm1438_vm3, %v1414_v43 }
 0x55b   :  { %v1235_v47 = vpop.f32.mrf.mxu2 }
 0x55c   :  { %v1255_v48 = vpack.c.bf16 %v1235_v47, %v1235_v47 }
 0x55e   :  { %1272 = vst.msk [vmem:[%s2607_s14 + $0x38] sm:$0xf] %vm1257_vm2, %v1255_v48 }
 0x560   :  { %v1417_v46 = vpop.f32.mrf.mxu0 }
 0x561   :  { %1448 = vst.msk [vmem:[%s2609_s16 + $0x48] sm:$0xff] %vm1438_vm3, %v1417_v46 }
 0x563   :  { %v1238_v11 = vpop.f32.mrf.mxu2 }
 0x564   :  { %v1256_v51 = vpack.c.bf16 %v1238_v11, %v1238_v11 }
 0x566   :  { %1273 = vst.msk [vmem:[%s2607_s14 + $0x3c] sm:$0xf] %vm1257_vm2, %v1256_v51 }
 0x568   :  { %v1420_v50 = vpop.f32.mrf.mxu0 }
 0x569   :  { %1449 = vst.msk [vmem:[%s2609_s16 + $0x50] sm:$0xff] %vm1438_vm3, %v1420_v50 }
 0x570   :  { %v1423_v2 = vpop.f32.mrf.mxu0 }
 0x571   :  { %1450 = vst.msk [vmem:[%s2609_s16 + $0x58] sm:$0xff] %vm1438_vm3, %v1423_v2 }
 0x578   :  { %v1426_v54 = vpop.f32.mrf.mxu0 }
 0x579   :  { %1451 = vst.msk [vmem:[%s2609_s16 + $0x60] sm:$0xff] %vm1438_vm3, %v1426_v54 }
 0x580   :  { %v1429_v55 = vpop.f32.mrf.mxu0 }
 0x581   :  { %1452 = vst.msk [vmem:[%s2609_s16 + $0x68] sm:$0xff] %vm1438_vm3, %v1429_v55 }
 0x588   :  { %v1432_v10 = vpop.f32.mrf.mxu0 }
 0x589   :  { %1453 = vst.msk [vmem:[%s2609_s16 + $0x70] sm:$0xff] %vm1438_vm3, %v1432_v10 }
 0x590   :  { %v1435_v56 = vpop.f32.mrf.mxu0 }
 0x591   :  { %1454 = vst.msk [vmem:[%s2609_s16 + $0x78] sm:$0xff] %vm1438_vm3, %v1435_v56 }

</bundles_post_ra>
